<compile_context>
chip_gen: v6e
topology: v6e:2x2x1
jax: 0.10.0
libtpu: 0.0.40
codegen_flags: <defaults>
</compile_context>

<pallas_src>
import functools

import jax
import jax.numpy as jnp
from jax.experimental import pallas as pl
from jax.experimental.pallas import tpu as pltpu


# ----------------------------------------------------------------------------
# Pallas kernel: full branch for one image
#   (1x1 conv[+BN scale] + bias + ReLU)
#   -> (depthwise KxK conv[+BN scale] + bias)
#   -> (1x1 conv[+BN scale] + bias + ReLU)
# All arrays lane-dense with Cp (=128) channels on the lane axis.
# ----------------------------------------------------------------------------
def _branch_kernel(x_ref, w1_ref, wdw_ref, w3_ref, bias_ref,
                   o_ref, pad_ref,
                   *, H, W, Cp, K, dil, pad):
    # --- 1x1 conv (BN scale pre-folded into w1): bf16 MXU matmul, f32 acc ---
    y1 = jnp.dot(x_ref[...], w1_ref[...], preferred_element_type=jnp.float32)
    y1 = jnp.maximum(y1 + bias_ref[0:1, :], 0.0)               # (H*W, Cp) f32

    # --- depthwise KxK conv (BN scale pre-folded into wdw) ------------------
    # Lane-dense padded scratch.  Zero only the halo ring on every grid step
    # (a program_id==0-gated init would leave garbage on the second core when
    # the "parallel" axis is split across TensorCores); interior overwritten.
    if pad > 0:
        zrow = jnp.zeros((pad, W + 2 * pad, Cp), jnp.float32)
        zcol = jnp.zeros((H + 2 * pad, pad, Cp), jnp.float32)
        pad_ref[0:pad, :, :] = zrow
        pad_ref[pad + H:, :, :] = zrow
        pad_ref[:, 0:pad, :] = zcol
        pad_ref[:, pad + W:, :] = zcol
    pad_ref[pad:pad + H, pad:pad + W, :] = y1.reshape(H, W, Cp)

    acc = jnp.zeros((H, W, Cp), jnp.float32)
    for dy in range(K):                                        # static unroll
        for dx in range(K):
            tap = pad_ref[dy * dil:dy * dil + H, dx * dil:dx * dil + W, :]
            acc = acc + tap * wdw_ref[dy * K + dx, :]
    y2 = acc.reshape(H * W, Cp) + bias_ref[1:2, :]

    # --- 1x1 conv (bf16 MXU, BN scale pre-folded) + bias + ReLU -------------
    y3 = jnp.dot(y2.astype(jnp.bfloat16), w3_ref[...],
                 preferred_element_type=jnp.float32)
    o_ref[...] = jnp.maximum(y3 + bias_ref[2:3, :], 0.0)


def _branch_pallas(x0_lane, pp, *, N, H, W, Cp, K, dil):
    pad = (K // 2) * dil
    HW = H * W
    rows = N * HW

    kern = functools.partial(_branch_kernel, H=H, W=W, Cp=Cp, K=K,
                             dil=dil, pad=pad)

    flops = rows * (2 * 2 * Cp * Cp + 2 * K * K * Cp)
    bytes_accessed = (rows * Cp * 2            # x (bf16)
                      + rows * Cp * 4          # out (f32)
                      + 2 * Cp * Cp * 2        # w1, w3 (bf16)
                      + K * K * Cp * 4         # depthwise weights
                      + 3 * Cp * 4)            # packed biases

    mat_spec = pl.BlockSpec((Cp, Cp), lambda n: (0, 0))

    return pl.pallas_call(
        kern,
        out_shape=jax.ShapeDtypeStruct((rows, Cp), jnp.float32),
        grid=(N,),
        in_specs=[
            pl.BlockSpec((HW, Cp), lambda n: (n, 0)),          # x0 (lane-dense)
            mat_spec,                                          # w1 (scale folded)
            pl.BlockSpec((K * K, Cp), lambda n: (0, 0)),       # wdw (scale folded)
            mat_spec,                                          # w3 (scale folded)
            pl.BlockSpec((3, Cp), lambda n: (0, 0)),           # biases b1,b2,b3
        ],
        out_specs=pl.BlockSpec((HW, Cp), lambda n: (n, 0)),
        scratch_shapes=[
            pltpu.VMEM((H + 2 * pad, W + 2 * pad, Cp), jnp.float32)],
        compiler_params=pltpu.CompilerParams(
            dimension_semantics=("parallel",),
            vmem_limit_bytes=64 * 1024 * 1024),
        cost_estimate=pl.CostEstimate(flops=flops, transcendentals=0,
                                      bytes_accessed=bytes_accessed),
    )(x0_lane, pp["w1"], pp["wdw"], pp["w3"], pp["bias"])


# ----------------------------------------------------------------------------
# Parameter prep
# ----------------------------------------------------------------------------
def _fold_params(p, K):
    """Fold BN (eval mode) scales into the conv weights; exact in f32."""
    Cb = p["b1"].shape[0]
    s1 = p["s1"].astype(jnp.float32)
    s2 = p["s2"].astype(jnp.float32)
    s3 = p["s3"].astype(jnp.float32)
    w1e = p["w1"].astype(jnp.float32) * s1[None, :]
    wdwe = p["wdw"].reshape(K * K, Cb).astype(jnp.float32) * s2[None, :]
    w3e = p["w3"].astype(jnp.float32) * s3[None, :]
    return dict(w1=w1e, b1=p["b1"].astype(jnp.float32),
                wdw=wdwe, b2=p["b2"].astype(jnp.float32),
                w3=w3e, b3=p["b3"].astype(jnp.float32))


def _prepare_params(p, Cb, Cp, K):
    """Channel-pad Cb -> Cp (=128), cast matmul weights to bf16, pack biases.

    Padded lanes stay exactly zero through the whole branch."""
    e = _fold_params(p, K)
    pc = Cp - Cb
    w1 = jnp.pad(e["w1"], ((0, pc), (0, pc))).astype(jnp.bfloat16)
    w3 = jnp.pad(e["w3"], ((0, pc), (0, pc))).astype(jnp.bfloat16)
    wdw = jnp.pad(e["wdw"], ((0, 0), (0, pc)))
    bias = jnp.pad(jnp.stack([e["b1"], e["b2"], e["b3"]], axis=0),
                   ((0, 0), (0, pc)))
    return dict(w1=w1, wdw=wdw, w3=w3, bias=bias)


# ----------------------------------------------------------------------------
# Full block (stride == 1):  split -> branch(x0) ++ x1 -> channel shuffle
# ----------------------------------------------------------------------------
def shufflenetv2_block(x, params, *, kernel_size=3, dilation=1, shuffle_group=2):
    N, C, H, W = x.shape
    Cb = C // 2 + C % 2                              # branch_channel
    Cp = 128 * pl.cdiv(Cb, 128)                      # lane-dense channel pad

    pp = _prepare_params(params, Cb, Cp, kernel_size)

    # NCHW -> lane-dense (N*H*W, Cp) bf16 for the branch input (single pass)
    x0 = jnp.transpose(x[:, :Cb], (0, 2, 3, 1)).reshape(N * H * W, Cb)
    x0 = jnp.pad(x0, ((0, 0), (0, Cp - Cb))).astype(jnp.bfloat16)

    y0_lane = _branch_pallas(x0, pp, N=N, H=H, W=W, Cp=Cp,
                             K=kernel_size, dil=dilation)

    y0 = y0_lane[:, :Cb].reshape(N, H, W, Cb).transpose(0, 3, 1, 2)   # NCHW
    x1 = x[:, Cb:]

    if shuffle_group == 2 and C % 2 == 0:
        # concat + channel-shuffle fused into one interleave:
        # shuffled channel 2j = branch(x0)[j], 2j+1 = x1[j]
        out = jnp.stack([y0, x1], axis=2).reshape(N, C, H, W)
    else:
        out = jnp.concatenate([y0, x1], axis=1)
        g = shuffle_group
        out = out.reshape(N, g, C // g, H, W).transpose(0, 2, 1, 3, 4)
        out = out.reshape(N, C, H, W)
    return out


# ----------------------------------------------------------------------------
# Pure-JAX references.
#  * mm_dtype=bf16 mirrors the kernel's matmul precision -> tight tolerance
#  * mm_dtype=f32 is the exact module math (BN fold is exact) -> loose check
# ----------------------------------------------------------------------------
def _ref_branch(x0_nhwc, eff, *, K, dil, mm_dtype):
    pad = (K // 2) * dil
    N, H, W, Cb = x0_nhwc.shape
    y = jnp.einsum("nhwc,cd->nhwd", x0_nhwc.astype(mm_dtype),
                   eff["w1"].astype(mm_dtype),
                   preferred_element_type=jnp.float32)
    y = jnp.maximum(y + eff["b1"], 0.0)
    yp = jnp.pad(y, ((0, 0), (pad, pad), (pad, pad), (0, 0)))
    acc = jnp.zeros_like(y)
    for dy in range(K):
        for dx in range(K):
            acc = acc + (yp[:, dy * dil:dy * dil + H, dx * dil:dx * dil + W, :]
                         * eff["wdw"][dy * K + dx])
    y = acc + eff["b2"]
    y = jnp.einsum("nhwc,cd->nhwd", y.astype(mm_dtype),
                   eff["w3"].astype(mm_dtype),
                   preferred_element_type=jnp.float32)
    return jnp.maximum(y + eff["b3"], 0.0)


def _ref_block(x, eff, *, kernel_size, dilation, shuffle_group, mm_dtype):
    N, C, H, W = x.shape
    Cb = C // 2 + C % 2
    x_nhwc = jnp.transpose(x, (0, 2, 3, 1))
    y0 = _ref_branch(x_nhwc[..., :Cb], eff, K=kernel_size, dil=dilation,
                     mm_dtype=mm_dtype)
    out = jnp.concatenate([y0, x_nhwc[..., Cb:]], axis=-1)
    out = jnp.transpose(out, (0, 3, 1, 2))
    g = shuffle_group
    out = out.reshape(N, g, C // g, H, W).transpose(0, 2, 1, 3, 4)
    return out.reshape(N, C, H, W)


# ----------------------------------------------------------------------------
# Deterministic parameters (BN folded into scale/bias, eval mode)
# ----------------------------------------------------------------------------
def make_params(key, Cb, kernel_size):
    eps = 1e-5
    keys = jax.random.split(key, 15)

    def bn_fold(kg, kb, km, kv):
        gamma = jax.random.uniform(kg, (Cb,), minval=0.5, maxval=1.5)
        beta = 0.1 * jax.random.normal(kb, (Cb,))
        mean = 0.1 * jax.random.normal(km, (Cb,))
        var = jax.random.uniform(kv, (Cb,), minval=0.5, maxval=1.5)
        scale = gamma / jnp.sqrt(var + eps)
        bias = beta - mean * scale
        return scale.astype(jnp.float32), bias.astype(jnp.float32)

    s1, b1 = bn_fold(*keys[0:4])
    s2, b2 = bn_fold(*keys[4:8])
    s3, b3 = bn_fold(*keys[8:12])
    w1 = (0.3 * jax.random.normal(keys[12], (Cb, Cb))).astype(jnp.float32)
    wdw = (0.3 * jax.random.normal(keys[13], (kernel_size, kernel_size, Cb))
           ).astype(jnp.float32)
    w3 = (0.3 * jax.random.normal(keys[14], (Cb, Cb))).astype(jnp.float32)
    return dict(w1=w1, s1=s1, b1=b1, wdw=wdw, s2=s2, b2=b2,
                w3=w3, s3=s3, b3=b3)


if __name__ == "__main__":
    N, C, H, W = 2, 8, 16, 16          # in_channel == out_channel (stride=1)
    kernel_size, dilation, shuffle_group = 3, 1, 2
    Cb = C // 2 + C % 2

    key = jax.random.PRNGKey(0)
    kx, kp = jax.random.split(key)
    x = jax.random.normal(kx, (N, C, H, W), dtype=jnp.float32)
    params = make_params(kp, Cb, kernel_size)

    fwd = jax.jit(functools.partial(shufflenetv2_block,
                                    kernel_size=kernel_size,
                                    dilation=dilation,
                                    shuffle_group=shuffle_group))
    out = jax.block_until_ready(fwd(x, params))
    assert out.shape == (N, C, H, W)

    eff = _fold_params(params, kernel_size)

    # Tight check: reference mirrors the kernel's bf16 matmul precision.
    ref_bf16 = _ref_block(x, eff, kernel_size=kernel_size, dilation=dilation,
                          shuffle_group=shuffle_group, mm_dtype=jnp.bfloat16)
    err_bf16 = float(jnp.max(jnp.abs(out - ref_bf16)))
    assert jnp.allclose(out, ref_bf16, rtol=5e-3, atol=5e-3), \
        f"mismatch vs bf16-mirrored reference (max abs err {err_bf16})"

    # Loose check: exact f32 module math (absorbs the bf16 matmul error).
    ref_f32 = _ref_block(x, eff, kernel_size=kernel_size, dilation=dilation,
                         shuffle_group=shuffle_group, mm_dtype=jnp.float32)
    err_f32 = float(jnp.max(jnp.abs(out - ref_f32)))
    assert jnp.allclose(out, ref_f32, rtol=5e-2, atol=5e-2), \
        f"mismatch vs f32 module reference (max abs err {err_f32})"

    print("KERNEL_OK")
</pallas_src>

<mosaic_0001>
module attributes {stable_mosaic.version = 11 : i64} {
  func.func @_branch_kernel(%arg0: i32, %arg1: memref<256x128xbf16, #tpu.memory_space<vmem>>, %arg2: memref<128x128xbf16, #tpu.memory_space<vmem>>, %arg3: memref<9x128xf32, #tpu.memory_space<vmem>>, %arg4: memref<128x128xbf16, #tpu.memory_space<vmem>>, %arg5: memref<3x128xf32, #tpu.memory_space<vmem>>, %arg6: memref<256x128xf32, #tpu.memory_space<vmem>>, %arg7: memref<18x18x128xf32, #tpu.memory_space<vmem>>) attributes {dimension_semantics = [#tpu.dimension_semantics<parallel>], iteration_bounds = array<i64: 2>, scalar_prefetch = 0 : i64, scratch_operands = 1 : i64, tpu.core_type = #tpu.core_type<tc>, window_params = [{transform_indices = @transform_0, window_bounds = array<i64: 256, 128>}, {pipeline_mode = #tpu.pipeline_mode<synchronous>, transform_indices = @transform_1, window_bounds = array<i64: 128, 128>}, {pipeline_mode = #tpu.pipeline_mode<synchronous>, transform_indices = @transform_2, window_bounds = array<i64: 9, 128>}, {pipeline_mode = #tpu.pipeline_mode<synchronous>, transform_indices = @transform_3, window_bounds = array<i64: 128, 128>}, {pipeline_mode = #tpu.pipeline_mode<synchronous>, transform_indices = @transform_4, window_bounds = array<i64: 3, 128>}, {transform_indices = @transform_5, window_bounds = array<i64: 256, 128>}]} {
    %c0 = arith.constant 0 : index
    %c0_0 = arith.constant 0 : index
    %0 = vector.load %arg1[%c0, %c0_0] : memref<256x128xbf16, #tpu.memory_space<vmem>>, vector<256x128xbf16>
    %c0_1 = arith.constant 0 : index
    %c0_2 = arith.constant 0 : index
    %1 = vector.load %arg2[%c0_1, %c0_2] : memref<128x128xbf16, #tpu.memory_space<vmem>>, vector<128x128xbf16>
    %cst = arith.constant dense<0.000000e+00> : vector<256x128xf32>
    %2 = tpu.matmul %0, %1, %cst {dimension_numbers = #tpu.dot_dimension_numbers<[1], [0], [0], [1], [0, 0, 1, 1], [], []>} : vector<256x128xbf16>, vector<128x128xbf16>, vector<256x128xf32> -> vector<256x128xf32>
    %c0_3 = arith.constant 0 : index
    %c0_4 = arith.constant 0 : index
    %3 = vector.load %arg5[%c0_3, %c0_4] : memref<3x128xf32, #tpu.memory_space<vmem>>, vector<1x128xf32>
    %4 = vector.broadcast %3 : vector<1x128xf32> to vector<256x128xf32>
    %5 = arith.addf %2, %4 : vector<256x128xf32>
    %cst_5 = arith.constant 0.000000e+00 : f32
    %6 = vector.broadcast %cst_5 : f32 to vector<256x128xf32>
    %7 = arith.maximumf %5, %6 : vector<256x128xf32>
    %cst_6 = arith.constant 0.000000e+00 : f32
    %8 = vector.broadcast %cst_6 : f32 to vector<1x18x128xf32>
    %cst_7 = arith.constant 0.000000e+00 : f32
    %9 = vector.broadcast %cst_7 : f32 to vector<18x1x128xf32>
    %c0_8 = arith.constant 0 : index
    %c0_9 = arith.constant 0 : index
    %c0_10 = arith.constant 0 : index
    %10 = vector.load %arg7[%c0_8, %c0_9, %c0_10] : memref<18x18x128xf32, #tpu.memory_space<vmem>>, vector<1x18x128xf32>
    tpu.vector_store %arg7[%c0_8, %c0_9, %c0_10], %8 {strides = array<i32>} : memref<18x18x128xf32, #tpu.memory_space<vmem>>, vector<1x18x128xf32>,
    %c17 = arith.constant 17 : index
    %c0_11 = arith.constant 0 : index
    %c0_12 = arith.constant 0 : index
    %11 = vector.load %arg7[%c17, %c0_11, %c0_12] : memref<18x18x128xf32, #tpu.memory_space<vmem>>, vector<1x18x128xf32>
    tpu.vector_store %arg7[%c17, %c0_11, %c0_12], %8 {strides = array<i32>} : memref<18x18x128xf32, #tpu.memory_space<vmem>>, vector<1x18x128xf32>,
    %c0_13 = arith.constant 0 : index
    %c0_14 = arith.constant 0 : index
    %c0_15 = arith.constant 0 : index
    %12 = vector.load %arg7[%c0_13, %c0_14, %c0_15] : memref<18x18x128xf32, #tpu.memory_space<vmem>>, vector<18x1x128xf32>
    tpu.vector_store %arg7[%c0_13, %c0_14, %c0_15], %9 {strides = array<i32>} : memref<18x18x128xf32, #tpu.memory_space<vmem>>, vector<18x1x128xf32>,
    %c0_16 = arith.constant 0 : index
    %c17_17 = arith.constant 17 : index
    %c0_18 = arith.constant 0 : index
    %13 = vector.load %arg7[%c0_16, %c17_17, %c0_18] : memref<18x18x128xf32, #tpu.memory_space<vmem>>, vector<18x1x128xf32>
    tpu.vector_store %arg7[%c0_16, %c17_17, %c0_18], %9 {strides = array<i32>} : memref<18x18x128xf32, #tpu.memory_space<vmem>>, vector<18x1x128xf32>,
    %14 = vector.shape_cast %7 : vector<256x128xf32> to vector<16x16x128xf32>
    %c1 = arith.constant 1 : index
    %c1_19 = arith.constant 1 : index
    %c0_20 = arith.constant 0 : index
    %15 = vector.load %arg7[%c1, %c1_19, %c0_20] : memref<18x18x128xf32, #tpu.memory_space<vmem>>, vector<16x16x128xf32>
    tpu.vector_store %arg7[%c1, %c1_19, %c0_20], %14 {strides = array<i32>} : memref<18x18x128xf32, #tpu.memory_space<vmem>>, vector<16x16x128xf32>,
    %cst_21 = arith.constant 0.000000e+00 : f32
    %16 = vector.broadcast %cst_21 : f32 to vector<16x16x128xf32>
    %c0_22 = arith.constant 0 : index
    %c0_23 = arith.constant 0 : index
    %c0_24 = arith.constant 0 : index
    %17 = vector.load %arg7[%c0_22, %c0_23, %c0_24] : memref<18x18x128xf32, #tpu.memory_space<vmem>>, vector<16x16x128xf32>
    %c0_25 = arith.constant 0 : index
    %c0_26 = arith.constant 0 : index
    %18 = vector.load %arg3[%c0_25, %c0_26] : memref<9x128xf32, #tpu.memory_space<vmem>>, vector<1x128xf32>
    %19 = vector.shape_cast %18 : vector<1x128xf32> to vector<128xf32>
    %20 = vector.shape_cast %19 : vector<128xf32> to vector<1x1x128xf32>
    %21 = vector.broadcast %20 : vector<1x1x128xf32> to vector<16x16x128xf32>
    %22 = arith.mulf %17, %21 : vector<16x16x128xf32>
    %23 = arith.addf %16, %22 : vector<16x16x128xf32>
    %c0_27 = arith.constant 0 : index
    %c1_28 = arith.constant 1 : index
    %c0_29 = arith.constant 0 : index
    %24 = vector.load %arg7[%c0_27, %c1_28, %c0_29] : memref<18x18x128xf32, #tpu.memory_space<vmem>>, vector<16x16x128xf32>
    %c1_30 = arith.constant 1 : index
    %c0_31 = arith.constant 0 : index
    %25 = vector.load %arg3[%c1_30, %c0_31] : memref<9x128xf32, #tpu.memory_space<vmem>>, vector<1x128xf32>
    %26 = vector.shape_cast %25 : vector<1x128xf32> to vector<128xf32>
    %27 = vector.shape_cast %26 : vector<128xf32> to vector<1x1x128xf32>
    %28 = vector.broadcast %27 : vector<1x1x128xf32> to vector<16x16x128xf32>
    %29 = arith.mulf %24, %28 : vector<16x16x128xf32>
    %30 = arith.addf %23, %29 : vector<16x16x128xf32>
    %c0_32 = arith.constant 0 : index
    %c2 = arith.constant 2 : index
    %c0_33 = arith.constant 0 : index
    %31 = vector.load %arg7[%c0_32, %c2, %c0_33] : memref<18x18x128xf32, #tpu.memory_space<vmem>>, vector<16x16x128xf32>
    %c2_34 = arith.constant 2 : index
    %c0_35 = arith.constant 0 : index
    %32 = vector.load %arg3[%c2_34, %c0_35] : memref<9x128xf32, #tpu.memory_space<vmem>>, vector<1x128xf32>
    %33 = vector.shape_cast %32 : vector<1x128xf32> to vector<128xf32>
    %34 = vector.shape_cast %33 : vector<128xf32> to vector<1x1x128xf32>
    %35 = vector.broadcast %34 : vector<1x1x128xf32> to vector<16x16x128xf32>
    %36 = arith.mulf %31, %35 : vector<16x16x128xf32>
    %37 = arith.addf %30, %36 : vector<16x16x128xf32>
    %c1_36 = arith.constant 1 : index
    %c0_37 = arith.constant 0 : index
    %c0_38 = arith.constant 0 : index
    %38 = vector.load %arg7[%c1_36, %c0_37, %c0_38] : memref<18x18x128xf32, #tpu.memory_space<vmem>>, vector<16x16x128xf32>
    %c3 = arith.constant 3 : index
    %c0_39 = arith.constant 0 : index
    %39 = vector.load %arg3[%c3, %c0_39] : memref<9x128xf32, #tpu.memory_space<vmem>>, vector<1x128xf32>
    %40 = vector.shape_cast %39 : vector<1x128xf32> to vector<128xf32>
    %41 = vector.shape_cast %40 : vector<128xf32> to vector<1x1x128xf32>
    %42 = vector.broadcast %41 : vector<1x1x128xf32> to vector<16x16x128xf32>
    %43 = arith.mulf %38, %42 : vector<16x16x128xf32>
    %44 = arith.addf %37, %43 : vector<16x16x128xf32>
    %c1_40 = arith.constant 1 : index
    %c1_41 = arith.constant 1 : index
    %c0_42 = arith.constant 0 : index
    %45 = vector.load %arg7[%c1_40, %c1_41, %c0_42] : memref<18x18x128xf32, #tpu.memory_space<vmem>>, vector<16x16x128xf32>
    %c4 = arith.constant 4 : index
    %c0_43 = arith.constant 0 : index
    %46 = vector.load %arg3[%c4, %c0_43] : memref<9x128xf32, #tpu.memory_space<vmem>>, vector<1x128xf32>
    %47 = vector.shape_cast %46 : vector<1x128xf32> to vector<128xf32>
    %48 = vector.shape_cast %47 : vector<128xf32> to vector<1x1x128xf32>
    %49 = vector.broadcast %48 : vector<1x1x128xf32> to vector<16x16x128xf32>
    %50 = arith.mulf %45, %49 : vector<16x16x128xf32>
    %51 = arith.addf %44, %50 : vector<16x16x128xf32>
    %c1_44 = arith.constant 1 : index
    %c2_45 = arith.constant 2 : index
    %c0_46 = arith.constant 0 : index
    %52 = vector.load %arg7[%c1_44, %c2_45, %c0_46] : memref<18x18x128xf32, #tpu.memory_space<vmem>>, vector<16x16x128xf32>
    %c5 = arith.constant 5 : index
    %c0_47 = arith.constant 0 : index
    %53 = vector.load %arg3[%c5, %c0_47] : memref<9x128xf32, #tpu.memory_space<vmem>>, vector<1x128xf32>
    %54 = vector.shape_cast %53 : vector<1x128xf32> to vector<128xf32>
    %55 = vector.shape_cast %54 : vector<128xf32> to vector<1x1x128xf32>
    %56 = vector.broadcast %55 : vector<1x1x128xf32> to vector<16x16x128xf32>
    %57 = arith.mulf %52, %56 : vector<16x16x128xf32>
    %58 = arith.addf %51, %57 : vector<16x16x128xf32>
    %c2_48 = arith.constant 2 : index
    %c0_49 = arith.constant 0 : index
    %c0_50 = arith.constant 0 : index
    %59 = vector.load %arg7[%c2_48, %c0_49, %c0_50] : memref<18x18x128xf32, #tpu.memory_space<vmem>>, vector<16x16x128xf32>
    %c6 = arith.constant 6 : index
    %c0_51 = arith.constant 0 : index
    %60 = vector.load %arg3[%c6, %c0_51] : memref<9x128xf32, #tpu.memory_space<vmem>>, vector<1x128xf32>
    %61 = vector.shape_cast %60 : vector<1x128xf32> to vector<128xf32>
    %62 = vector.shape_cast %61 : vector<128xf32> to vector<1x1x128xf32>
    %63 = vector.broadcast %62 : vector<1x1x128xf32> to vector<16x16x128xf32>
    %64 = arith.mulf %59, %63 : vector<16x16x128xf32>
    %65 = arith.addf %58, %64 : vector<16x16x128xf32>
    %c2_52 = arith.constant 2 : index
    %c1_53 = arith.constant 1 : index
    %c0_54 = arith.constant 0 : index
    %66 = vector.load %arg7[%c2_52, %c1_53, %c0_54] : memref<18x18x128xf32, #tpu.memory_space<vmem>>, vector<16x16x128xf32>
    %c7 = arith.constant 7 : index
    %c0_55 = arith.constant 0 : index
    %67 = vector.load %arg3[%c7, %c0_55] : memref<9x128xf32, #tpu.memory_space<vmem>>, vector<1x128xf32>
    %68 = vector.shape_cast %67 : vector<1x128xf32> to vector<128xf32>
    %69 = vector.shape_cast %68 : vector<128xf32> to vector<1x1x128xf32>
    %70 = vector.broadcast %69 : vector<1x1x128xf32> to vector<16x16x128xf32>
    %71 = arith.mulf %66, %70 : vector<16x16x128xf32>
    %72 = arith.addf %65, %71 : vector<16x16x128xf32>
    %c2_56 = arith.constant 2 : index
    %c2_57 = arith.constant 2 : index
    %c0_58 = arith.constant 0 : index
    %73 = vector.load %arg7[%c2_56, %c2_57, %c0_58] : memref<18x18x128xf32, #tpu.memory_space<vmem>>, vector<16x16x128xf32>
    %c8 = arith.constant 8 : index
    %c0_59 = arith.constant 0 : index
    %74 = vector.load %arg3[%c8, %c0_59] : memref<9x128xf32, #tpu.memory_space<vmem>>, vector<1x128xf32>
    %75 = vector.shape_cast %74 : vector<1x128xf32> to vector<128xf32>
    %76 = vector.shape_cast %75 : vector<128xf32> to vector<1x1x128xf32>
    %77 = vector.broadcast %76 : vector<1x1x128xf32> to vector<16x16x128xf32>
    %78 = arith.mulf %73, %77 : vector<16x16x128xf32>
    %79 = arith.addf %72, %78 : vector<16x16x128xf32>
    %80 = vector.shape_cast %79 : vector<16x16x128xf32> to vector<256x128xf32>
    %c1_60 = arith.constant 1 : index
    %c0_61 = arith.constant 0 : index
    %81 = vector.load %arg5[%c1_60, %c0_61] : memref<3x128xf32, #tpu.memory_space<vmem>>, vector<1x128xf32>
    %82 = vector.broadcast %81 : vector<1x128xf32> to vector<256x128xf32>
    %83 = arith.addf %80, %82 : vector<256x128xf32>
    %84 = arith.truncf %83 : vector<256x128xf32> to vector<256x128xbf16>
    %c0_62 = arith.constant 0 : index
    %c0_63 = arith.constant 0 : index
    %85 = vector.load %arg4[%c0_62, %c0_63] : memref<128x128xbf16, #tpu.memory_space<vmem>>, vector<128x128xbf16>
    %cst_64 = arith.constant dense<0.000000e+00> : vector<256x128xf32>
    %86 = tpu.matmul %84, %85, %cst_64 {dimension_numbers = #tpu.dot_dimension_numbers<[1], [0], [0], [1], [0, 0, 1, 1], [], []>} : vector<256x128xbf16>, vector<128x128xbf16>, vector<256x128xf32> -> vector<256x128xf32>
    %c2_65 = arith.constant 2 : index
    %c0_66 = arith.constant 0 : index
    %87 = vector.load %arg5[%c2_65, %c0_66] : memref<3x128xf32, #tpu.memory_space<vmem>>, vector<1x128xf32>
    %88 = vector.broadcast %87 : vector<1x128xf32> to vector<256x128xf32>
    %89 = arith.addf %86, %88 : vector<256x128xf32>
    %cst_67 = arith.constant 0.000000e+00 : f32
    %90 = vector.broadcast %cst_67 : f32 to vector<256x128xf32>
    %91 = arith.maximumf %89, %90 : vector<256x128xf32>
    %c0_68 = arith.constant 0 : index
    %c0_69 = arith.constant 0 : index
    %92 = vector.load %arg6[%c0_68, %c0_69] : memref<256x128xf32, #tpu.memory_space<vmem>>, vector<256x128xf32>
    tpu.vector_store %arg6[%c0_68, %c0_69], %91 {strides = array<i32>} : memref<256x128xf32, #tpu.memory_space<vmem>>, vector<256x128xf32>,
    return
  }
  func.func @transform_0(%arg0: i32) -> (i32, i32) {
    %c0_i32 = arith.constant 0 : i32
    %c0_i32_0 = arith.constant 0 : i32
    return %arg0, %c0_i32 : i32, i32
  }
  func.func @transform_1(%arg0: i32) -> (i32, i32) {
    %c0_i32 = arith.constant 0 : i32
    %c0_i32_0 = arith.constant 0 : i32
    %c0_i32_1 = arith.constant 0 : i32
    return %c0_i32, %c0_i32_0 : i32, i32
  }
  func.func @transform_2(%arg0: i32) -> (i32, i32) {
    %c0_i32 = arith.constant 0 : i32
    %c0_i32_0 = arith.constant 0 : i32
    %c0_i32_1 = arith.constant 0 : i32
    return %c0_i32, %c0_i32_0 : i32, i32
  }
  func.func @transform_3(%arg0: i32) -> (i32, i32) {
    %c0_i32 = arith.constant 0 : i32
    %c0_i32_0 = arith.constant 0 : i32
    %c0_i32_1 = arith.constant 0 : i32
    return %c0_i32, %c0_i32_0 : i32, i32
  }
  func.func @transform_4(%arg0: i32) -> (i32, i32) {
    %c0_i32 = arith.constant 0 : i32
    %c0_i32_0 = arith.constant 0 : i32
    %c0_i32_1 = arith.constant 0 : i32
    return %c0_i32, %c0_i32_0 : i32, i32
  }
  func.func @transform_5(%arg0: i32) -> (i32, i32) {
    %c0_i32 = arith.constant 0 : i32
    %c0_i32_0 = arith.constant 0 : i32
    return %arg0, %c0_i32 : i32, i32
  }
}

</mosaic_0001>

<bundles_post_ra>
// kernel: shufflenetv2_block.1
= control target key start
LH: loop header
LB: loop body
LE: loop exit
PB: predicated region body
PF: predicated region fallthrough
CT: control target
= control target key end

     0   :  { %s2298_s18 = smov 0   ;;  %s3260_s0 = inlined_call_operand.vmem [shape: bf16[512,128], index: 0, kind: input, shape index: {}]   ;;  %s3261_s1 = inlined_call_operand.vmem [shape: bf16[128,128], index: 1, kind: input, shape index: {}]   ;;  %s3262_s2 = inlined_call_operand.vmem [shape: f32[9,128], index: 2, kind: input, shape index: {}]   ;;  %s3263_s3 = inlined_call_operand.vmem [shape: bf16[128,128], index: 3, kind: input, shape index: {}]   ;;  %s3264_s4 = inlined_call_operand.vmem [shape: f32[3,128], index: 4, kind: input, shape index: {}]   ;;  %s3265_s5 = inlined_call_operand.vmem [shape: f32[512,128], index: 5, kind: output, shape index: {}]  }
   0x1 LB: > { %s2008_s19 = sadd.s32 4294967295, %s2265_s18   ;;  %p2012_p0 = scmp.ge.s32.totalorder %s2265_s18, 1  ;;  %s2265_s18 = sphi %s2298_s18, %s15_s18  }
   0x2   : > { %p188_p1 = scmp.lt.s32.totalorder %s2265_s18, 3 }
   0x4   : > { %p189_p2 = pnand %p2012_p0, %p188_p1 }
   0x5   : > { %s2013_s22 = sshll.u32 (!%p189_p2), %s2008_s19, 5 }
   0x6   : > { %192 = sbr.rel (%p189_p2) target bundleno = 619 (0x26b), region = 40  ;;  %p217_p3 = scmp.lt.s32.totalorder (!%p189_p2), %s2013_s22, 63 }
   0xb   : > { %v2216_v0 = vld [vmem:[%s3261_s1 + $0x38] sm:$0xff]   ;;  %v2217_v1 = vld [vmem:[%s3261_s1 + $0x30] sm:$0xff]   ;;  %s3267_s22 = smov (!%p217_p3, %s2013_s22), 63  ;;  %v2218_v2 = vld [vmem:[%s3261_s1 + $0x28] sm:$0xff]   ;;  %v2267_v24 = vmov 0.0  }
   0xc   : > { %2111 = vmatprep.subr.bf16.mxu0 %v2216_v0  ;;  %s2014_s27 = sshll.u32 %s3267_s22, 2  ;;  %v2219_v3 = vld [vmem:[%s3261_s1 + $0x20] sm:$0xff]   ;;  %v2220_v5 = vld [vmem:[%s3261_s1 + $0x18] sm:$0xff]   ;;  %v2221_v6 = vld [vmem:[%s3261_s1 + $0x10] sm:$0xff]   ;;  %619 = vst [vmem:[#allocation2] sm:$0xff] %v2267_v24  ;;  %s2016_s7 = sshll.u32 %s3267_s22, 3 }
   0xd   : > { %2112 = vmatpush3.bf16.msra.mxu0 %v2216_v0  ;;  %s2321_s30 = scalar_lea.vmem %s3260_s0, %s2014_s27  ;;  %v2222_v7 = vld [vmem:[%s3261_s1 + $0x8] sm:$0xff]   ;;  %v2223_v8 = vld [vmem:[%s3261_s1] sm:$0xff]   ;;  %620 = vst [vmem:[#allocation2 + $0x8] sm:$0xff] %v2267_v24  ;;  %621 = vst [vmem:[#allocation2 + $0x10] sm:$0x3] %v2267_v24  ;;  %s3192_s10 = scalar_lea.vmem %s3265_s5, %s2016_s7 }
   0xe   : > { %2113 = vmatprep.subr.bf16.mxu0 %v2217_v1  ;;  %v2224_v4 = vld [vmem:[%s2321_s30] sm:$0xff]   ;;  %v2225_v9 = vld [vmem:[%s2321_s30 + $0x8] sm:$0xff]   ;;  %v2226_v10 = vld [vmem:[%s2321_s30 + $0x10] sm:$0xff]   ;;  %627 = vst [vmem:[#allocation2 + $0x18] sm:$0x1] %v2267_v24 }
   0xf   : > { %2127 = vmatprep.mubr.bf16.mxu0 %v2224_v4  ;;  %v2227_v11 = vld [vmem:[%s2321_s30 + $0x18] sm:$0xff]   ;;  %v2228_v12 = vld [vmem:[%s2321_s30 + $0x20] sm:$0xff]   ;;  %v2229_v13 = vld [vmem:[%s2321_s30 + $0x28] sm:$0xff]   ;;  %628 = vst [vmem:[#allocation2 + $0x30] sm:$0x1] %v2267_v24 }
  0x10   : > { %v2230_v14 = vld [vmem:[%s2321_s30 + $0x30] sm:$0xff]   ;;  %v2231_v15 = vld [vmem:[%s2321_s30 + $0x38] sm:$0xff]   ;;  %v2232_v16 = vld [vmem:[%s2321_s30 + $0x40] sm:$0xff]   ;;  %645 = vst [vmem:[#allocation2 + $0x29] sm:$0x1] %v2267_v24 }
  0x11   : > { %2114 = vmatpush3.bf16.msra.mxu0 %v2217_v1  ;;  %v2233_v17 = vld [vmem:[%s2321_s30 + $0x48] sm:$0xff]   ;;  %v2234_v18 = vld [vmem:[%s2321_s30 + $0x50] sm:$0xff]   ;;  %v2235_v19 = vld [vmem:[%s2321_s30 + $0x58] sm:$0xff]   ;;  %646 = vst [vmem:[#allocation2 + $0x41] sm:$0x1] %v2267_v24 }
  0x12   : > { %2115 = vmatprep.subr.bf16.mxu0 %v2218_v2  ;;  %v2236_v20 = vld [vmem:[%s2321_s30 + $0x60] sm:$0xff]   ;;  %v2237_v21 = vld [vmem:[%s2321_s30 + $0x68] sm:$0xff]   ;;  %v2238_v22 = vld [vmem:[%s2321_s30 + $0x70] sm:$0xff]   ;;  %623 = vst [vmem:[#allocation2 + $0x198] sm:$0xff] %v2267_v24 }
  0x13   : > { %v2239_v23 = vld [vmem:[%s2321_s30 + $0x78] sm:$0xff]   ;;  %624 = vst [vmem:[#allocation2 + $0x1a0] sm:$0xff] %v2267_v24  ;;  %625 = vst [vmem:[#allocation2 + $0x1a8] sm:$0x3] %v2267_v24  ;;  %v2241_v26 = vld [vmem:[%s3263_s3 + $0x30] sm:$0xff]  }
  0x14   : > { %629 = vst [vmem:[#allocation2 + $0x48] sm:$0x1] %v2267_v24  ;;  %630 = vst [vmem:[#allocation2 + $0x60] sm:$0x1] %v2267_v24  ;;  %v2240_v25 = vld [vmem:[%s3263_s3 + $0x38] sm:$0xff]   ;;  %v2242_v27 = vld [vmem:[%s3263_s3 + $0x28] sm:$0xff]  }
  0x15   : > { %2116 = vmatpush3.bf16.msra.mxu0 %v2218_v2  ;;  %631 = vst [vmem:[#allocation2 + $0x78] sm:$0x1] %v2267_v24  ;;  %632 = vst [vmem:[#allocation2 + $0x90] sm:$0x1] %v2267_v24  ;;  %2159 = vmatprep.subr.bf16.mxu1 %v2240_v25  ;;  %v2243_v28 = vld [vmem:[%s3263_s3 + $0x20] sm:$0xff]   ;;  %v2244_v29 = vld [vmem:[%s3263_s3 + $0x18] sm:$0xff]  }
  0x16   : > { %2117 = vmatprep.subr.bf16.mxu0 %v2219_v3  ;;  %633 = vst [vmem:[#allocation2 + $0xa8] sm:$0x1] %v2267_v24  ;;  %634 = vst [vmem:[#allocation2 + $0xc0] sm:$0x1] %v2267_v24  ;;  %2160 = vmatpush3.bf16.msra.mxu1 %v2240_v25  ;;  %v2245_v30 = vld [vmem:[%s3263_s3 + $0x10] sm:$0xff]   ;;  %v2246_v31 = vld [vmem:[%s3263_s3 + $0x8] sm:$0xff]  }
  0x17   : > { %635 = vst [vmem:[#allocation2 + $0xd8] sm:$0x1] %v2267_v24  ;;  %636 = vst [vmem:[#allocation2 + $0xf0] sm:$0x1] %v2267_v24  ;;  %2161 = vmatprep.subr.bf16.mxu1 %v2241_v26  ;;  %v2247_v32 = vld [vmem:[%s3263_s3] sm:$0xff]   ;;  %v797_v37 = vld [vmem:[#allocation2 + $0x9] sm:$0xff] }
  0x18   : > { %637 = vst [vmem:[#allocation2 + $0x108] sm:$0x1] %v2267_v24  ;;  %638 = vst [vmem:[#allocation2 + $0x120] sm:$0x1] %v2267_v24  ;;  %v2381_v34 = vld [vmem:[%s3262_s2] ss:$0 sm:$0xff] }
  0x19   : > { %2118 = vmatpush3.bf16.msra.mxu0 %v2219_v3  ;;  %639 = vst [vmem:[#allocation2 + $0x138] sm:$0x1] %v2267_v24  ;;  %640 = vst [vmem:[#allocation2 + $0x150] sm:$0x1] %v2267_v24  ;;  %v796_v35 = vld [vmem:[#allocation2 + $0x1] sm:$0xff]  ;;  %v733_v43 = vmul.f32 0.0, %v2381_v34 }
  0x1a   : > { %2119 = vmatprep.subr.bf16.mxu0 %v2220_v5  ;;  %641 = vst [vmem:[#allocation2 + $0x168] sm:$0x1] %v2267_v24  ;;  %642 = vst [vmem:[#allocation2 + $0x180] sm:$0x1] %v2267_v24  ;;  %2162 = vmatpush3.bf16.msra.mxu1 %v2241_v26  ;;  %v2386_v36 = vld [vmem:[%s3264_s4] ss:$0 sm:$0xff] }
  0x1b   : > { %647 = vst [vmem:[#allocation2 + $0x59] sm:$0x1] %v2267_v24  ;;  %648 = vst [vmem:[#allocation2 + $0x71] sm:$0x1] %v2267_v24  ;;  %2163 = vmatprep.subr.bf16.mxu1 %v2242_v27  ;;  %v2391_v38 = vld [vmem:[%s3262_s2 + $0x1] ss:$0 sm:$0xff] }
  0x1c   : > { %649 = vst [vmem:[#allocation2 + $0x89] sm:$0x1] %v2267_v24  ;;  %650 = vst [vmem:[#allocation2 + $0xa1] sm:$0x1] %v2267_v24  ;;  %v833_v41 = vmul.f32 %v2391_v38, %v796_v35  ;;  %v834_v44 = vmul.f32 %v2391_v38, %v797_v37  ;;  %v897_v45 = vld [vmem:[#allocation2 + $0x2] sm:$0xff] }
  0x1d   : > { %2120 = vmatpush3.bf16.msra.mxu0 %v2220_v5  ;;  %651 = vst [vmem:[#allocation2 + $0xb9] sm:$0x1] %v2267_v24  ;;  %652 = vst [vmem:[#allocation2 + $0xd1] sm:$0x1] %v2267_v24  ;;  %v2401_v46 = vld [vmem:[%s3262_s2 + $0x2] ss:$0 sm:$0xff] }
  0x1e   : > { %2121 = vmatprep.subr.bf16.mxu0 %v2221_v6  ;;  %653 = vst [vmem:[#allocation2 + $0xe9] sm:$0x1] %v2267_v24  ;;  %654 = vst [vmem:[#allocation2 + $0x101] sm:$0x1] %v2267_v24  ;;  %2164 = vmatpush3.bf16.msra.mxu1 %v2242_v27  ;;  %v934_v53 = vmul.f32 %v2401_v46, %v897_v45  ;;  %v866_v56 = vadd.f32 %v834_v44, %v733_v43  ;;  %v2411_v61 = vld [vmem:[%s3262_s2 + $0x4] ss:$0 sm:$0xff] }
  0x1f   : > { %655 = vst [vmem:[#allocation2 + $0x119] sm:$0x1] %v2267_v24  ;;  %656 = vst [vmem:[#allocation2 + $0x131] sm:$0x1] %v2267_v24  ;;  %2165 = vmatprep.subr.bf16.mxu1 %v2243_v28  ;;  %v2416_v62 = vld [vmem:[%s3262_s2 + $0x7] ss:$0 sm:$0xff] }
  0x20   : > { %657 = vst [vmem:[#allocation2 + $0x149] sm:$0x1] %v2267_v24  ;;  %658 = vst [vmem:[#allocation2 + $0x161] sm:$0x1] %v2267_v24  ;;  %v2424_v5 = vld [vmem:[%s3262_s2 + $0x3] ss:$0 sm:$0xff] }
  0x21   : > { %2122 = vmatpush3.bf16.msra.mxu0 %v2221_v6  ;;  %659 = vst [vmem:[#allocation2 + $0x179] sm:$0x1] %v2267_v24  ;;  %660 = vst [vmem:[#allocation2 + $0x191] sm:$0x1] %v2267_v24  ;;  %v2478_v35 = vld [vmem:[%s3262_s2 + $0x8] ss:$0 sm:$0xff] }
  0x22   : > { %2123 = vmatprep.subr.bf16.mxu0 %v2222_v7  ;;  %626 = vst [vmem:[#allocation2] sm:$0x1] %v2267_v24  ;;  %644 = vst [vmem:[#allocation2 + $0x11] sm:$0x1] %v2267_v24  ;;  %2166 = vmatpush3.bf16.msra.mxu1 %v2243_v28 }
  0x23   : > { %643 = vst [vmem:[#allocation2 + $0x198] sm:$0x1] %v2267_v24  ;;  %661 = vst [vmem:[#allocation2 + $0x1a9] sm:$0x1] %v2267_v24  ;;  %2167 = vmatprep.subr.bf16.mxu1 %v2244_v29 }
  0x25   : > { %2124 = vmatpush3.bf16.msra.mxu0 %v2222_v7  ;;  %v2430_v7 = vld [vmem:[%s3262_s2 + $0x6] ss:$0 sm:$0xff] }
  0x26   : > { %2125 = vmatprep.subr.bf16.mxu0 %v2223_v8  ;;  %2168 = vmatpush3.bf16.msra.mxu1 %v2244_v29 }
  0x27   : > { %2169 = vmatprep.subr.bf16.mxu1 %v2245_v30 }
  0x29   : > { %2126 = vmatpush3.bf16.msra.mxu0 %v2223_v8  ;;  %v695_v33 = vld [vmem:[#allocation2] sm:$0xff]  ;;  %v898_v48 = vld [vmem:[#allocation2 + $0xa] sm:$0xff] }
  0x2a   : > { %2170 = vmatpush3.bf16.msra.mxu1 %v2245_v30  ;;  %v732_v40 = vmul.f32 %v2381_v34, %v695_v33  ;;  %v935_v57 = vmul.f32 %v2401_v46, %v898_v48 }
  0x2b   : > { %2171 = vmatprep.subr.bf16.mxu1 %v2246_v31 }
  0x2c   : > { %2128 = vmatmul.mubr.bf16.vlgmr.msra.gmra.mxu0 %v2225_v9  ;;  %v865_v52 = vadd.f32 %v833_v41, %v732_v40  ;;  %v2419_v3 = vadd.f32 %v935_v57, %v866_v56 }
  0x2d   : > { %2131 = vmatprep.mubr.bf16.mxu0 %v2226_v10 }
  0x2e   : > { %2172 = vmatpush3.bf16.msra.mxu1 %v2246_v31  ;;  %v966_v2 = vadd.f32 %v934_v53, %v865_v52 }
  0x2f   : > { %2173 = vmatprep.subr.bf16.mxu1 %v2247_v32 }
  0x32   : > { %2174 = vmatpush3.bf16.msra.mxu1 %v2247_v32 }
  0x34   : > { %2132 = vmatmul.mubr.bf16.gmra.mxu0 %v2227_v11 }
  0x35   : > { %2135 = vmatprep.mubr.bf16.mxu0 %v2228_v12 }
  0x3c   : > { %2136 = vmatmul.mubr.bf16.gmra.mxu0 %v2229_v13 }
  0x3d   : > { %2139 = vmatprep.mubr.bf16.mxu0 %v2230_v14 }
  0x44   : > { %2140 = vmatmul.mubr.bf16.gmra.mxu0 %v2231_v15 }
  0x45   : > { %2143 = vmatprep.mubr.bf16.mxu0 %v2232_v16 }
  0x4c   : > { %2144 = vmatmul.mubr.bf16.gmra.mxu0 %v2233_v17 }
  0x4d   : > { %2147 = vmatprep.mubr.bf16.mxu0 %v2234_v18 }
  0x54   : > { %2148 = vmatmul.mubr.bf16.gmra.mxu0 %v2235_v19 }
  0x55   : > { %2151 = vmatprep.mubr.bf16.mxu0 %v2236_v20 }
  0x5c   : > { %2152 = vmatmul.mubr.bf16.gmra.mxu0 %v2237_v21 }
  0x5d   : > { %2155 = vmatprep.mubr.bf16.mxu0 %v2238_v22 }
  0x64   : > { %2156 = vmatmul.mubr.bf16.gmra.mxu0 %v2239_v23 }
  0xec   : > { %v2129_v39 = vpop.f32.mrf.mxu0 }
  0xed   : > { %v469_v42 = vadd.f32 %v2129_v39, %v2386_v36 }
  0xee   : > { %v460_v47 = vpop.f32.mrf.mxu0 }
  0xef   : > { %v589_v49 = vmax.f32 %v469_v42, 0.0  ;;  %v461_v50 = vadd.f32 %v2386_v36, %v460_v47 }
  0xf0   : > { %v2130_v51 = vpop.f32.mrf.mxu0 }
  0xf1   : > { %665 = vst [vmem:[#allocation2 + $0x31] sm:$0xff] %v589_v49  ;;  %v587_v54 = vmax.f32 %v461_v50, 0.0  ;;  %v472_v55 = vadd.f32 %v2130_v51, %v2386_v36  ;;  %v2433_v8 = vmul.f32 %v2416_v62, %v589_v49  ;;  %v2436_v9 = vmul.f32 %v2411_v61, %v589_v49 }
  0xf2   : > { %v463_v58 = vpop.f32.mrf.mxu0  ;;  %v837_v10 = vmul.f32 %v2391_v38, %v589_v49 }
  0xf3   : > { %663 = vst [vmem:[#allocation2 + $0x19] sm:$0xff] %v587_v54  ;;  %v590_v59 = vmax.f32 %v472_v55, 0.0  ;;  %v464_v60 = vadd.f32 %v2386_v36, %v463_v58  ;;  %v1136_v6 = vmul.f32 %v2411_v61, %v587_v54  ;;  %v835_v14 = vmul.f32 %v2391_v38, %v587_v54 }
  0xf4   : > { %v2133_v63 = vpop.f32.mrf.mxu0 }
  0xf5   : > { %666 = vst [vmem:[#allocation2 + $0x39] sm:$0xff] %v590_v59  ;;  %v588_v0 = vmax.f32 %v464_v60, 0.0  ;;  %v485_v1 = vadd.f32 %v2133_v63, %v2386_v36  ;;  %v2441_v13 = vmul.f32 %v2416_v62, %v590_v59  ;;  %v2449_v19 = vmul.f32 %v2411_v61, %v590_v59 }
  0xf6   : > { %v476_v4 = vpop.f32.mrf.mxu0  ;;  %v2452_v20 = vmul.f32 %v2391_v38, %v590_v59 }
  0xf7   : > { %664 = vst [vmem:[#allocation2 + $0x21] sm:$0xff] %v588_v0  ;;  %v593_v11 = vmax.f32 %v485_v1, 0.0  ;;  %v477_v12 = vadd.f32 %v2386_v36, %v476_v4  ;;  %v2445_v16 = vmul.f32 %v2411_v61, %v588_v0  ;;  %v836_v18 = vmul.f32 %v2391_v38, %v588_v0 }
  0xf8   : > { %v2134_v15 = vpop.f32.mrf.mxu0  ;;  %v1302_v17 = vld [vmem:[#allocation2 + $0x30] sm:$0xff] }
  0xf9   : > { %669 = vst [vmem:[#allocation2 + $0x61] sm:$0xff] %v593_v11  ;;  %v591_v21 = vmax.f32 %v477_v12, 0.0  ;;  %v488_v22 = vadd.f32 %v2134_v15, %v2386_v36  ;;  %v2456_v23 = vmul.f32 %v2430_v7, %v1302_v17  ;;  %v2459_v24 = vmul.f32 %v2424_v5, %v1302_v17 }
  0xfa   : > { %v479_v25 = vpop.f32.mrf.mxu0  ;;  %v998_v26 = vld [vmem:[#allocation2 + $0x18] sm:$0xff]  ;;  %v736_v27 = vmul.f32 %v2381_v34, %v1302_v17  ;;  %v2463_v28 = vmul.f32 %v2416_v62, %v593_v11  ;;  %v2466_v29 = vmul.f32 %v2411_v61, %v593_v11  ;;  %v2469_v30 = vmul.f32 %v2391_v38, %v593_v11 }
  0xfb   : > { %667 = vst [vmem:[#allocation2 + $0x49] sm:$0xff] %v591_v21  ;;  %v2471_v31 = vmax.f32 %v488_v22, 0.0  ;;  %v480_v32 = vadd.f32 %v2386_v36, %v479_v25  ;;  %v1035_v33 = vmul.f32 %v2424_v5, %v998_v26  ;;  %v734_v37 = vmul.f32 %v2381_v34, %v998_v26 }
  0xfc   : > { %v2137_v39 = vpop.f32.mrf.mxu0  ;;  %v2481_v40 = vld [vmem:[#allocation2 + $0x38] sm:$0xff]  ;;  %v2488_v43 = vmul.f32 %v2416_v62, %v591_v21  ;;  %v2490_v44 = vadd.f32 %v837_v10, %v736_v27  ;;  %v2493_v45 = vmul.f32 %v2411_v61, %v591_v21  ;;  %v2496_v47 = vmul.f32 %v2391_v38, %v591_v21 }
  0xfd   : > { %v2483_v41 = vld [vmem:[#allocation2 + $0x32] sm:$0xff]  ;;  %v2485_v42 = vld [vmem:[#allocation2 + $0x3a] sm:$0xff]  ;;  %670 = vst [vmem:[#allocation2 + $0x69] sm:$0xff] %v2471_v31  ;;  %v2499_v48 = vmax.f32 %v480_v32, 0.0  ;;  %v501_v49 = vadd.f32 %v2137_v39, %v2386_v36  ;;  %v1067_v50 = vadd.f32 %v1035_v33, %v966_v2  ;;  %v1340_v51 = vmul.f32 %v2430_v7, %v2481_v40  ;;  %v2520_v2 = vld [vmem:[%s3262_s2 + $0x5] ss:$0 sm:$0xff] }
  0xfe   : > { %v492_v52 = vpop.f32.mrf.mxu0  ;;  %v999_v53 = vld [vmem:[#allocation2 + $0x20] sm:$0xff]  ;;  %v1541_v56 = vmul.f32 %v2478_v35, %v2483_v41  ;;  %v2508_v57 = vmul.f32 %v2478_v35, %v2485_v42  ;;  %v867_v58 = vadd.f32 %v835_v14, %v734_v37  ;;  %v1038_v59 = vmul.f32 %v2424_v5, %v2481_v40 }
  0xff   : > { %v1200_v54 = vld [vmem:[#allocation2 + $0x1a] sm:$0xff]  ;;  %v1201_v55 = vld [vmem:[#allocation2 + $0x22] sm:$0xff]  ;;  %668 = vst [vmem:[#allocation2 + $0x51] sm:$0xff] %v2499_v48  ;;  %v2513_v60 = vmax.f32 %v501_v49, 0.0  ;;  %v493_v63 = vadd.f32 %v2386_v36, %v492_v52  ;;  %v1036_v0 = vmul.f32 %v2424_v5, %v999_v53  ;;  %v1168_v1 = vadd.f32 %v1136_v6, %v1067_v50 }
 0x100   : > { %v2138_v4 = vpop.f32.mrf.mxu0  ;;  %v1237_v10 = vmul.f32 %v2520_v2, %v1200_v54  ;;  %v1238_v11 = vmul.f32 %v2520_v2, %v1201_v55  ;;  %v735_v12 = vmul.f32 %v2381_v34, %v999_v53  ;;  %v936_v14 = vmul.f32 %v2401_v46, %v1200_v54 }
 0x101   : > { %673 = vst [vmem:[#allocation2 + $0x91] sm:$0xff] %v2513_v60  ;;  %v2527_v15 = vmax.f32 %v493_v63, 0.0  ;;  %v504_v6 = vadd.f32 %v2138_v4, %v2386_v36  ;;  %v1068_v17 = vadd.f32 %v1036_v0, %v2419_v3  ;;  %v937_v21 = vmul.f32 %v2401_v46, %v1201_v55 }
 0x102   : > { %v495_v22 = vpop.f32.mrf.mxu0  ;;  %v1269_v25 = vadd.f32 %v1237_v10, %v1168_v1  ;;  %v868_v26 = vadd.f32 %v836_v18, %v735_v12  ;;  %v968_v27 = vadd.f32 %v936_v14, %v867_v58  ;;  %v1239_v32 = vmul.f32 %v2520_v2, %v2483_v41  ;;  %v2534_v33 = vld [vmem:[#allocation2 + $0x48] sm:$0xff] }
 0x103   : > { %671 = vst [vmem:[#allocation2 + $0x79] sm:$0xff] %v2527_v15  ;;  %v2537_v37 = vmax.f32 %v504_v6, 0.0  ;;  %v496_v39 = vadd.f32 %v2386_v36, %v495_v22  ;;  %v1169_v49 = vadd.f32 %v2445_v16, %v1068_v17  ;;  %v1240_v3 = vmul.f32 %v2520_v2, %v2485_v42 }
 0x104   : > { %v2141_v50 = vpop.f32.mrf.mxu0  ;;  %v1371_v18 = vadd.f32 %v2456_v23, %v1269_v25  ;;  %v969_v52 = vadd.f32 %v937_v21, %v868_v26  ;;  %v1069_v53 = vadd.f32 %v2459_v24, %v968_v27  ;;  %v1341_v54 = vmul.f32 %v2430_v7, %v2534_v33 }
 0x105   : > { %674 = vst [vmem:[#allocation2 + $0x99] sm:$0xff] %v2537_v37  ;;  %v2548_v55 = vmax.f32 %v496_v39, 0.0  ;;  %v517_v58 = vadd.f32 %v2141_v50, %v2386_v36  ;;  %v1270_v63 = vadd.f32 %v1238_v11, %v1169_v49  ;;  %v1443_v16 = vmul.f32 %v2416_v62, %v2499_v48 }
 0x106   : > { %v508_v0 = vpop.f32.mrf.mxu0  ;;  %v1472_v1 = vadd.f32 %v2433_v8, %v1371_v18  ;;  %v1070_v23 = vadd.f32 %v1038_v59, %v969_v52  ;;  %v1170_v4 = vadd.f32 %v2436_v9, %v1069_v53  ;;  %v2555_v24 = vld [vmem:[#allocation2 + $0x50] sm:$0xff]  ;;  %v737_v14 = vmul.f32 %v2381_v34, %v2481_v40  ;;  %v2568_v8 = vld [vmem:[%s3264_s4 + $0x1] ss:$0 sm:$0xff] }
 0x107   : > { %v2557_v10 = vld [vmem:[#allocation2 + $0x4a] sm:$0xff]  ;;  %v2559_v12 = vld [vmem:[#allocation2 + $0x52] sm:$0xff]  ;;  %672 = vst [vmem:[#allocation2 + $0x81] sm:$0xff] %v2548_v55  ;;  %v601_v11 = vmax.f32 %v517_v58, 0.0  ;;  %v509_v6 = vadd.f32 %v2386_v36, %v508_v0  ;;  %v1372_v17 = vadd.f32 %v1340_v51, %v1270_v63  ;;  %v1342_v9 = vmul.f32 %v2430_v7, %v2555_v24 }
 0x108   : > { %v2142_v59 = vpop.f32.mrf.mxu0  ;;  %v1573_v21 = vadd.f32 %v1541_v56, %v1472_v1  ;;  %v1171_v22 = vadd.f32 %v2449_v19, %v1070_v23  ;;  %v1271_v25 = vadd.f32 %v1239_v32, %v1170_v4  ;;  %v1543_v40 = vmul.f32 %v2478_v35, %v2557_v10 }
 0x109   : > { %677 = vst [vmem:[#allocation2 + $0xc1] sm:$0xff] %v601_v11  ;;  %v2575_v26 = vmax.f32 %v509_v6, 0.0  ;;  %v2578_v51 = vadd.f32 %v2142_v59, %v2386_v36  ;;  %v1473_v27 = vadd.f32 %v2441_v13, %v1372_v17  ;;  %v1544_v39 = vmul.f32 %v2478_v35, %v2559_v12  ;;  %v2607_v59 = vld [vmem:[#allocation2 + $0x60] sm:$0xff] }
 0x10a   : > { %v511_v49 = vpop.f32.mrf.mxu0  ;;  %v1610_v56 = vadd.f32 %v2568_v8, %v1573_v21  ;;  %v1272_v50 = vadd.f32 %v1240_v3, %v1171_v22  ;;  %v1373_v19 = vadd.f32 %v1341_v54, %v1271_v25  ;;  %v870_v32 = vadd.f32 %v2452_v20, %v737_v14 }
 0x10b   : > { %675 = vst [vmem:[#allocation2 + $0xa9] sm:$0xff] %v2575_v26  ;;  %v602_v18 = vmax.f32 %v2578_v51, 0.0  ;;  %v512_v52 = vadd.f32 %v2386_v36, %v511_v49  ;;  %v1574_v53 = vadd.f32 %v2508_v57, %v1473_v27  ;;  %v938_v13 = vmul.f32 %v2401_v46, %v2483_v41 }
 0x10c   : > { %v2145_v58 = vpop.f32.mrf.mxu0  ;;  %v1374_v63 = vadd.f32 %v1342_v9, %v1272_v50  ;;  %v1474_v0 = vadd.f32 %v2488_v43, %v1373_v19  ;;  %v939_v3 = vmul.f32 %v2401_v46, %v2485_v42  ;;  %v1039_v20 = vmul.f32 %v2424_v5, %v2534_v33  ;;  %v2618_v19 = vld [vmem:[#allocation2 + $0x62] sm:$0xff] }
 0x10d   : > { %678 = vst [vmem:[#allocation2 + $0xc9] sm:$0xff] %v602_v18  ;;  %v2598_v54 = vmax.f32 %v512_v52, 0.0  ;;  %v533_v57 = vadd.f32 %v2145_v58, %v2386_v36  ;;  %v1611_v1 = vadd.f32 %v2568_v8, %v1574_v53  ;;  %v970_v41 = vadd.f32 %v938_v13, %v2490_v44  ;;  %v2625_v58 = vld [vmem:[#allocation2 + $0x6a] sm:$0xff] }
 0x10e   : > { %v524_v23 = vpop.f32.mrf.mxu0  ;;  %v1475_v4 = vadd.f32 %v1443_v16, %v1374_v63  ;;  %v1575_v43 = vadd.f32 %v1543_v40, %v1474_v0  ;;  %v971_v14 = vadd.f32 %v939_v3, %v870_v32  ;;  %v1040_v42 = vmul.f32 %v2424_v5, %v2555_v24  ;;  %v2612_v40 = vld [vmem:[#allocation2 + $0x68] sm:$0xff] }
 0x10f   : > { %676 = vst [vmem:[#allocation2 + $0xb1] sm:$0xff] %v2598_v54  ;;  %v605_v11 = vmax.f32 %v533_v57, 0.0  ;;  %v525_v6 = vadd.f32 %v2386_v36, %v524_v23  ;;  %v1642_v17 = vpack.c.bf16 %v1611_v1, %v1610_v56  ;;  %v1071_v9 = vadd.f32 %v1039_v20, %v970_v41 }
 0x110   : > { %v2146_v21 = vpop.f32.mrf.mxu0  ;;  %v1576_v22 = vadd.f32 %v1544_v39, %v1475_v4  ;;  %v1612_v44 = vadd.f32 %v2568_v8, %v1575_v43  ;;  %v1072_v25 = vadd.f32 %v1040_v42, %v971_v14  ;;  %v1141_v16 = vmul.f32 %v2411_v61, %v2499_v48 }
 0x111   : > { %681 = vst [vmem:[#allocation2 + $0xf1] sm:$0xff] %v605_v11  ;;  %v603_v27 = vmax.f32 %v525_v6, 0.0  ;;  %v536_v49 = vadd.f32 %v2146_v21, %v2386_v36  ;;  %2175 = vmatprep.mubr.bf16.mxu1 %v1642_v17  ;;  %v1172_v56 = vadd.f32 %v2493_v45, %v1071_v9  ;;  %v1241_v50 = vmul.f32 %v2520_v2, %v2557_v10 }
 0x112   : > { %v527_v39 = vpop.f32.mrf.mxu0  ;;  %v1613_v32 = vadd.f32 %v2568_v8, %v1576_v22  ;;  %v1173_v52 = vadd.f32 %v1141_v16, %v1072_v25  ;;  %v1242_v53 = vmul.f32 %v2520_v2, %v2559_v12  ;;  %v1343_v13 = vmul.f32 %v2430_v7, %v2607_v59 }
 0x113   : > { %679 = vst [vmem:[#allocation2 + $0xd9] sm:$0xff] %v603_v27  ;;  %v606_v63 = vmax.f32 %v536_v49, 0.0  ;;  %v528_v45 = vadd.f32 %v2386_v36, %v527_v39  ;;  %v1273_v0 = vadd.f32 %v1241_v50, %v1172_v56  ;;  %v1344_v3 = vmul.f32 %v2430_v7, %v2612_v40 }
 0x114   : > { %v2149_v20 = vpop.f32.mrf.mxu0  ;;  %v1643_v57 = vpack.c.bf16 %v1613_v32, %v1612_v44  ;;  %v1274_v1 = vadd.f32 %v1242_v53, %v1173_v52  ;;  %v1445_v41 = vmul.f32 %v2416_v62, %v2471_v31  ;;  %v1545_v23 = vmul.f32 %v2478_v35, %v2618_v19 }
 0x115   : > { %682 = vst [vmem:[#allocation2 + $0xf9] sm:$0xff] %v606_v63  ;;  %v2634_v4 = vmax.f32 %v528_v45, 0.0  ;;  %v549_v43 = vadd.f32 %v2149_v20, %v2386_v36  ;;  %v1375_v14 = vadd.f32 %v1343_v13, %v1273_v0  ;;  %v1546_v42 = vmul.f32 %v2478_v35, %v2625_v58  ;;  %v2660_v13 = vld [vmem:[#allocation2 + $0x78] sm:$0xff] }
 0x116   : > { %2176 = vmatmul.mubr.bf16.vlgmr.msra.gmra.mxu1 %v1643_v57  ;;  %v540_v11 = vpop.f32.mrf.mxu0  ;;  %v1376_v6 = vadd.f32 %v1344_v3, %v1274_v1  ;;  %v738_v17 = vmul.f32 %v2381_v34, %v2534_v33  ;;  %v739_v9 = vmul.f32 %v2381_v34, %v2555_v24  ;;  %v840_v21 = vmul.f32 %v2391_v38, %v2499_v48  ;;  %v2667_v3 = vld [vmem:[#allocation2 + $0x80] sm:$0xff] }
 0x117   : > { %680 = vst [vmem:[#allocation2 + $0xe1] sm:$0xff] %v2634_v4  ;;  %v609_v22 = vmax.f32 %v549_v43, 0.0  ;;  %v541_v44 = vadd.f32 %v2386_v36, %v540_v11  ;;  %v1476_v25 = vadd.f32 %v2463_v28, %v1375_v14  ;;  %v940_v16 = vmul.f32 %v2401_v46, %v2557_v10  ;;  %v2672_v43 = vld [vmem:[#allocation2 + $0x7a] sm:$0xff] }
 0x118   : > { %v2150_v27 = vpop.f32.mrf.mxu0  ;;  %v1477_v49 = vadd.f32 %v1445_v41, %v1376_v6  ;;  %v871_v33 = vadd.f32 %v2496_v47, %v738_v17  ;;  %v872_v56 = vadd.f32 %v840_v21, %v739_v9  ;;  %v941_v24 = vmul.f32 %v2401_v46, %v2559_v12  ;;  %v2681_v17 = vld [vmem:[#allocation2 + $0x82] sm:$0xff] }
 0x119   : > { %685 = vst [vmem:[#allocation2 + $0x121] sm:$0xff] %v609_v22  ;;  %v2653_v48 = vmax.f32 %v541_v44, 0.0  ;;  %v552_v50 = vadd.f32 %v2150_v27, %v2386_v36  ;;  %v1577_v39 = vadd.f32 %v1545_v23, %v1476_v25  ;;  %v1041_v28 = vmul.f32 %v2424_v5, %v2607_v59 }
 0x11a   : > { %v1578_v32 = vadd.f32 %v1546_v42, %v1477_v49  ;;  %v543_v52 = vpop.f32.mrf.mxu0  ;;  %v972_v10 = vadd.f32 %v940_v16, %v871_v33  ;;  %v973_v53 = vadd.f32 %v941_v24, %v872_v56  ;;  %v1042_v47 = vmul.f32 %v2424_v5, %v2612_v40 }
 0x11b   : > { %683 = vst [vmem:[#allocation2 + $0x109] sm:$0xff] %v2653_v48  ;;  %v610_v12 = vmax.f32 %v552_v50, 0.0  ;;  %v1614_v63 = vadd.f32 %v2568_v8, %v1577_v39  ;;  %v544_v45 = vadd.f32 %v2386_v36, %v543_v52  ;;  %v1143_v0 = vmul.f32 %v2411_v61, %v2471_v31 }
 0x11c   : > { %v1615_v20 = vadd.f32 %v2568_v8, %v1578_v32  ;;  %v2153_v57 = vpop.f32.mrf.mxu0  ;;  %v1073_v1 = vadd.f32 %v1041_v28, %v972_v10  ;;  %v1074_v41 = vadd.f32 %v1042_v47, %v973_v53  ;;  %v1243_v23 = vmul.f32 %v2520_v2, %v2618_v19 }
 0x11d   : > { %686 = vst [vmem:[#allocation2 + $0x129] sm:$0xff] %v610_v12  ;;  %v2674_v14 = vmax.f32 %v544_v45, 0.0  ;;  %v565_v42 = vadd.f32 %v2153_v57, %v2386_v36  ;;  %v1244_v11 = vmul.f32 %v2520_v2, %v2625_v58  ;;  %v1345_v6 = vmul.f32 %v2430_v7, %v2660_v13 }
 0x11e   : > { %v1644_v9 = vpack.c.bf16 %v1615_v20, %v1614_v63  ;;  %v1174_v21 = vadd.f32 %v2466_v29, %v1073_v1  ;;  %v1175_v22 = vadd.f32 %v1143_v0, %v1074_v41  ;;  %v1346_v44 = vmul.f32 %v2430_v7, %v2667_v3  ;;  %v556_v25 = vpop.f32.mrf.mxu0 }
 0x11f   : > { %684 = vst [vmem:[#allocation2 + $0x111] sm:$0xff] %v2674_v14  ;;  %v613_v16 = vmax.f32 %v565_v42, 0.0  ;;  %v1446_v27 = vmul.f32 %v2416_v62, %v2527_v15  ;;  %v1447_v49 = vmul.f32 %v2416_v62, %v2548_v55  ;;  %v1547_v33 = vmul.f32 %v2478_v35, %v2672_v43  ;;  %v2722_v42 = vld [vmem:[#allocation2 + $0x98] sm:$0xff] }
 0x120   : > { %2179 = vmatprep.mubr.bf16.mxu1 %v1644_v9  ;;  %v1275_v56 = vadd.f32 %v1243_v23, %v1174_v21  ;;  %v1276_v29 = vadd.f32 %v1244_v11, %v1175_v22  ;;  %v1548_v24 = vmul.f32 %v2478_v35, %v2681_v17  ;;  %v557_v50 = vadd.f32 %v2386_v36, %v556_v25  ;;  %v2154_v39 = vpop.f32.mrf.mxu0  ;;  %v2720_v23 = vld [vmem:[#allocation2 + $0x90] sm:$0xff] }
 0x121   : > { %689 = vst [vmem:[#allocation2 + $0x151] sm:$0xff] %v613_v16  ;;  %v2697_v28 = vadd.f32 %v2154_v39, %v2386_v36  ;;  %v740_v32 = vmul.f32 %v2381_v34, %v2607_v59  ;;  %v741_v52 = vmul.f32 %v2381_v34, %v2612_v40  ;;  %v842_v10 = vmul.f32 %v2391_v38, %v2471_v31 }
 0x122   : > { %v1377_v53 = vadd.f32 %v1345_v6, %v1275_v56  ;;  %v1378_v47 = vadd.f32 %v1346_v44, %v1276_v29  ;;  %v2705_v12 = vmax.f32 %v557_v50, 0.0  ;;  %v942_v63 = vmul.f32 %v2401_v46, %v2618_v19  ;;  %v559_v57 = vpop.f32.mrf.mxu0 }
 0x123   : > { %v614_v45 = vmax.f32 %v2697_v28, 0.0  ;;  %v873_v0 = vadd.f32 %v2469_v30, %v740_v32  ;;  %v874_v20 = vadd.f32 %v842_v10, %v741_v52  ;;  %v943_v59 = vmul.f32 %v2401_v46, %v2625_v58  ;;  %v2742_v52 = vld [vmem:[#allocation2 + $0x92] sm:$0xff] }
 0x124   : > { %v1478_v40 = vadd.f32 %v1446_v27, %v1377_v53  ;;  %v1479_v1 = vadd.f32 %v1447_v49, %v1378_v47  ;;  %687 = vst [vmem:[#allocation2 + $0x139] sm:$0xff] %v2705_v12  ;;  %v1043_v31 = vmul.f32 %v2424_v5, %v2660_v13  ;;  %v1044_v41 = vmul.f32 %v2424_v5, %v2667_v3  ;;  %v2157_v16 = vpop.f32.mrf.mxu0 }
 0x125   : > { %690 = vst [vmem:[#allocation2 + $0x159] sm:$0xff] %v614_v45  ;;  %v974_v19 = vadd.f32 %v942_v63, %v873_v0  ;;  %v975_v30 = vadd.f32 %v943_v59, %v874_v20  ;;  %v1144_v6 = vmul.f32 %v2411_v61, %v2527_v15  ;;  %v1145_v9 = vmul.f32 %v2411_v61, %v2548_v55  ;;  %v1513_v20 = vld [vmem:[#allocation2 + $0x9a] sm:$0xff] }
 0x126   : > { %v1579_v58 = vadd.f32 %v1547_v33, %v1478_v40  ;;  %v1580_v11 = vadd.f32 %v1548_v24, %v1479_v1  ;;  %v1245_v44 = vmul.f32 %v2520_v2, %v2672_v43  ;;  %v1246_v25 = vmul.f32 %v2520_v2, %v2681_v17 }
 0x127   : > { %v1075_v21 = vadd.f32 %v1043_v31, %v974_v19  ;;  %v1076_v22 = vadd.f32 %v1044_v41, %v975_v30  ;;  %v1347_v33 = vmul.f32 %v2430_v7, %v2720_v23  ;;  %v1348_v56 = vmul.f32 %v2430_v7, %v2722_v42 }
 0x128   : > { %v1616_v27 = vadd.f32 %v2568_v8, %v1579_v58  ;;  %v1617_v49 = vadd.f32 %v2568_v8, %v1580_v11  ;;  %v1448_v50 = vmul.f32 %v2416_v62, %v2513_v60  ;;  %v1449_v39 = vmul.f32 %v2416_v62, %v2537_v37 }
 0x129   : > { %v1176_v29 = vadd.f32 %v1144_v6, %v1075_v21  ;;  %v1177_v24 = vadd.f32 %v1145_v9, %v1076_v22  ;;  %v560_v10 = vadd.f32 %v2386_v36, %v559_v57  ;;  %v581_v53 = vadd.f32 %v2157_v16, %v2386_v36 }
 0x12a   : > { %v1645_v32 = vpack.c.bf16 %v1617_v49, %v1616_v27  ;;  %v742_v47 = vmul.f32 %v2381_v34, %v2660_v13  ;;  %v743_v59 = vmul.f32 %v2381_v34, %v2667_v3  ;;  %v843_v40 = vmul.f32 %v2391_v38, %v2527_v15  ;;  %v572_v3 = vpop.f32.mrf.mxu0 }
 0x12b   : > { %v1277_v63 = vadd.f32 %v1245_v44, %v1176_v29  ;;  %v1278_v0 = vadd.f32 %v1246_v25, %v1177_v24  ;;  %v2752_v1 = vmax.f32 %v560_v10, 0.0  ;;  %v617_v31 = vmax.f32 %v581_v53, 0.0  ;;  %v2768_v44 = vld [vmem:[#allocation2 + $0xa8] sm:$0xff]  ;;  %v2770_v25 = vld [vmem:[#allocation2 + $0xb0] sm:$0xff] }
 0x12c   : > { %2180 = vmatmul.mubr.bf16.gmra.mxu1 %v1645_v32  ;;  %v844_v57 = vmul.f32 %v2391_v38, %v2548_v55  ;;  %v944_v41 = vmul.f32 %v2401_v46, %v2672_v43  ;;  %v1549_v30 = vmul.f32 %v2478_v35, %v2742_v52  ;;  %v875_v58 = vadd.f32 %v843_v40, %v742_v47 }
 0x12d   : > { %v1379_v13 = vadd.f32 %v1347_v33, %v1277_v63  ;;  %v1380_v19 = vadd.f32 %v1348_v56, %v1278_v0  ;;  %v1550_v11 = vmul.f32 %v2478_v35, %v1513_v20  ;;  %688 = vst [vmem:[#allocation2 + $0x141] sm:$0xff] %v2752_v1  ;;  %693 = vst [vmem:[#allocation2 + $0x181] sm:$0xff] %v617_v31 }
 0x12e   : > { %v876_v15 = vadd.f32 %v844_v57, %v743_v59  ;;  %v945_v6 = vmul.f32 %v2401_v46, %v2681_v17  ;;  %v1045_v55 = vmul.f32 %v2424_v5, %v2720_v23  ;;  %v976_v21 = vadd.f32 %v944_v41, %v875_v58 }
 0x12f   : > { %v1480_v43 = vadd.f32 %v1448_v50, %v1379_v13  ;;  %v1481_v9 = vadd.f32 %v1449_v39, %v1380_v19  ;;  %v1046_v22 = vmul.f32 %v2424_v5, %v2722_v42  ;;  %v1146_v27 = vmul.f32 %v2411_v61, %v2513_v60  ;;  %v2158_v50 = vpop.f32.mrf.mxu0 }
 0x130   : > { %v977_v16 = vadd.f32 %v945_v6, %v876_v15  ;;  %v1147_v17 = vmul.f32 %v2411_v61, %v2537_v37  ;;  %v1247_v49 = vmul.f32 %v2520_v2, %v2742_v52  ;;  %v1077_v29 = vadd.f32 %v1045_v55, %v976_v21  ;;  %v1514_v15 = vld [vmem:[#allocation2 + $0xaa] sm:$0xff]  ;;  %v1515_v6 = vld [vmem:[#allocation2 + $0xb2] sm:$0xff] }
 0x131   : > { %v1581_v33 = vadd.f32 %v1549_v30, %v1480_v43  ;;  %v1582_v56 = vadd.f32 %v1550_v11, %v1481_v9  ;;  %v1248_v24 = vmul.f32 %v2520_v2, %v1513_v20  ;;  %v1349_v32 = vmul.f32 %v2430_v7, %v2768_v44 }
 0x132   : > { %v1078_v39 = vadd.f32 %v1046_v22, %v977_v16  ;;  %v1350_v10 = vmul.f32 %v2430_v7, %v2770_v25  ;;  %v1450_v53 = vmul.f32 %v2416_v62, %v2575_v26  ;;  %v1178_v0 = vadd.f32 %v1146_v27, %v1077_v29 }
 0x133   : > { %v1618_v47 = vadd.f32 %v2568_v8, %v1581_v33  ;;  %v1619_v63 = vadd.f32 %v2568_v8, %v1582_v56  ;;  %v1451_v59 = vmul.f32 %v2416_v62, %v2598_v54  ;;  %v573_v31 = vadd.f32 %v2386_v36, %v572_v3  ;;  %v2818_v33 = vld [vmem:[#allocation2 + $0xc8] sm:$0xff] }
 0x134   : > { %v1179_v40 = vadd.f32 %v1147_v17, %v1078_v39  ;;  %v2791_v57 = vadd.f32 %v2158_v50, %v2386_v36  ;;  %v744_v41 = vmul.f32 %v2381_v34, %v2720_v23  ;;  %v1279_v19 = vadd.f32 %v1247_v49, %v1178_v0  ;;  %v2824_v39 = vld [vmem:[#allocation2 + $0xc1] sm:$0xff] }
 0x135   : > { %v1646_v13 = vpack.c.bf16 %v1619_v63, %v1618_v47  ;;  %v745_v30 = vmul.f32 %v2381_v34, %v2722_v42  ;;  %v845_v58 = vmul.f32 %v2391_v38, %v2513_v60  ;;  %v2799_v55 = vmax.f32 %v573_v31, 0.0  ;;  %v575_v63 = vpop.f32.mrf.mxu0  ;;  %v810_v31 = vld [vmem:[#allocation2 + $0xa9] sm:$0xff] }
 0x136   : > { %v1280_v11 = vadd.f32 %v1248_v24, %v1179_v40  ;;  %v618_v3 = vmax.f32 %v2791_v57, 0.0  ;;  %v846_v43 = vmul.f32 %v2391_v38, %v2537_v37  ;;  %v1381_v23 = vadd.f32 %v1349_v32, %v1279_v19 }
 0x137   : > { %2183 = vmatprep.mubr.bf16.mxu1 %v1646_v13  ;;  %v877_v9 = vadd.f32 %v845_v58, %v744_v41  ;;  %v946_v21 = vmul.f32 %v2401_v46, %v2742_v52  ;;  %v947_v42 = vmul.f32 %v2401_v46, %v1513_v20  ;;  %691 = vst [vmem:[#allocation2 + $0x169] sm:$0xff] %v2799_v55  ;;  %v2816_v20 = vld [vmem:[#allocation2 + $0xc0] sm:$0xff]  ;;  %v811_v41 = vld [vmem:[#allocation2 + $0xb1] sm:$0xff] }
 0x138   : > { %v1382_v22 = vadd.f32 %v1350_v10, %v1280_v11  ;;  %694 = vst [vmem:[#allocation2 + $0x189] sm:$0xff] %v618_v3  ;;  %v878_v60 = vadd.f32 %v846_v43, %v745_v30  ;;  %v1047_v16 = vmul.f32 %v2424_v5, %v2768_v44  ;;  %v1048_v37 = vmul.f32 %v2424_v5, %v2770_v25 }
 0x139   : > { %v1482_v27 = vadd.f32 %v1450_v53, %v1381_v23  ;;  %v1551_v17 = vmul.f32 %v2478_v35, %v1514_v15  ;;  %v1552_v52 = vmul.f32 %v2478_v35, %v1515_v6  ;;  %v978_v49 = vadd.f32 %v946_v21, %v877_v9  ;;  %v1516_v21 = vld [vmem:[#allocation2 + $0xc2] sm:$0xff] }
 0x13a   : > { %v1483_v56 = vadd.f32 %v1451_v59, %v1382_v22  ;;  %v979_v29 = vadd.f32 %v947_v42, %v878_v60  ;;  %v1148_v24 = vmul.f32 %v2411_v61, %v2575_v26  ;;  %v1149_v50 = vmul.f32 %v2411_v61, %v2598_v54  ;;  %v1517_v42 = vld [vmem:[#allocation2 + $0xca] sm:$0xff] }
 0x13b   : > { %v1583_v32 = vadd.f32 %v1551_v17, %v1482_v27  ;;  %v1079_v10 = vadd.f32 %v1047_v16, %v978_v49  ;;  %v1249_v53 = vmul.f32 %v2520_v2, %v1514_v15  ;;  %v1250_v47 = vmul.f32 %v2520_v2, %v1515_v6  ;;  %v1114_v49 = vld [vmem:[#allocation2 + $0xc9] sm:$0xff] }
 0x13c   : > { %v1584_v0 = vadd.f32 %v1552_v52, %v1483_v56  ;;  %v1080_v40 = vadd.f32 %v1048_v37, %v979_v29  ;;  %v1351_v59 = vmul.f32 %v2430_v7, %v2816_v20  ;;  %v1352_v26 = vmul.f32 %v2430_v7, %v2818_v33 }
 0x13d   : > { %v1620_v54 = vadd.f32 %v2568_v8, %v1583_v32  ;;  %v1180_v13 = vadd.f32 %v1148_v24, %v1079_v10  ;;  %v1452_v19 = vmul.f32 %v2416_v62, %v2824_v39  ;;  %v1453_v30 = vmul.f32 %v2416_v62, %v602_v18 }
 0x13e   : > { %v1621_v58 = vadd.f32 %v2568_v8, %v1584_v0  ;;  %v1181_v11 = vadd.f32 %v1149_v50, %v1080_v40  ;;  %v576_v43 = vadd.f32 %v2386_v36, %v575_v63  ;;  %v746_v23 = vmul.f32 %v2381_v34, %v2768_v44 }
 0x13f   : > { %v1281_v9 = vadd.f32 %v1249_v53, %v1180_v13  ;;  %v747_v22 = vmul.f32 %v2381_v34, %v2770_v25  ;;  %v847_v60 = vmul.f32 %v2391_v38, %v810_v31  ;;  %v848_v51 = vmul.f32 %v2391_v38, %v811_v41  ;;  %v2857_v53 = vld [vmem:[#allocation2 + $0xd8] sm:$0xff] }
 0x140   : > { %v1647_v16 = vpack.c.bf16 %v1621_v58, %v1620_v54  ;;  %v1282_v18 = vadd.f32 %v1250_v47, %v1181_v11  ;;  %v2846_v37 = vmax.f32 %v576_v43, 0.0  ;;  %v948_v27 = vmul.f32 %v2401_v46, %v1514_v15  ;;  %v2861_v47 = vld [vmem:[#allocation2 + $0xd9] sm:$0xff] }
 0x141   : > { %v1383_v36 = vadd.f32 %v1351_v59, %v1281_v9  ;;  %v879_v17 = vadd.f32 %v847_v60, %v746_v23  ;;  %v880_v52 = vadd.f32 %v848_v51, %v747_v22  ;;  %v949_v44 = vmul.f32 %v2401_v46, %v1515_v6  ;;  %v2859_v6 = vld [vmem:[#allocation2 + $0xe0] sm:$0xff] }
 0x142   : > { %2184 = vmatmul.mubr.bf16.gmra.mxu1 %v1647_v16  ;;  %v1384_v56 = vadd.f32 %v1352_v26, %v1282_v18  ;;  %v1553_v25 = vmul.f32 %v2478_v35, %v1516_v21  ;;  %v1554_v29 = vmul.f32 %v2478_v35, %v1517_v42  ;;  %692 = vst [vmem:[#allocation2 + $0x171] sm:$0xff] %v2846_v37 }
 0x143   : > { %v1049_v24 = vmul.f32 %v2424_v5, %v2816_v20  ;;  %v1484_v50 = vadd.f32 %v1452_v19, %v1383_v36  ;;  %v980_v32 = vadd.f32 %v948_v27, %v879_v17  ;;  %v981_v15 = vadd.f32 %v949_v44, %v880_v52  ;;  %v1518_v36 = vld [vmem:[#allocation2 + $0xda] sm:$0xff]  ;;  %v1519_v17 = vld [vmem:[#allocation2 + $0xe2] sm:$0xff] }
 0x144   : > { %v1050_v10 = vmul.f32 %v2424_v5, %v2818_v33  ;;  %v1485_v63 = vadd.f32 %v1453_v30, %v1384_v56  ;;  %v1150_v0 = vmul.f32 %v2411_v61, %v2824_v39  ;;  %v1151_v40 = vmul.f32 %v2411_v61, %v1114_v49 }
 0x145   : > { %v1251_v59 = vmul.f32 %v2520_v2, %v1516_v21  ;;  %v1585_v26 = vadd.f32 %v1553_v25, %v1484_v50  ;;  %v1081_v31 = vadd.f32 %v1049_v24, %v980_v32  ;;  %v1252_v54 = vmul.f32 %v2520_v2, %v1517_v42  ;;  %v2891_v50 = vld [vmem:[#allocation2 + $0xf0] sm:$0xff]  ;;  %v2897_v32 = vld [vmem:[#allocation2 + $0xf8] sm:$0xff] }
 0x146   : > { %v1082_v41 = vadd.f32 %v1050_v10, %v981_v15  ;;  %v1586_v13 = vadd.f32 %v1554_v29, %v1485_v63  ;;  %v1353_v19 = vmul.f32 %v2430_v7, %v2857_v53  ;;  %v1354_v58 = vmul.f32 %v2430_v7, %v2859_v6 }
 0x147   : > { %v1454_v30 = vmul.f32 %v2416_v62, %v2861_v47  ;;  %v1622_v11 = vadd.f32 %v2568_v8, %v1585_v26  ;;  %v1182_v43 = vadd.f32 %v1150_v0, %v1081_v31  ;;  %v1455_v9 = vmul.f32 %v2416_v62, %v2634_v4 }
 0x148   : > { %v1183_v23 = vadd.f32 %v1151_v40, %v1082_v41  ;;  %v1623_v22 = vadd.f32 %v2568_v8, %v1586_v13  ;;  %v748_v60 = vmul.f32 %v2381_v34, %v2816_v20  ;;  %v749_v51 = vmul.f32 %v2381_v34, %v2818_v33  ;;  %v2901_v40 = vld [vmem:[#allocation2 + $0xf1] sm:$0xff] }
 0x149   : > { %v849_v16 = vmul.f32 %v2391_v38, %v2824_v39  ;;  %v1283_v18 = vadd.f32 %v1251_v59, %v1182_v43  ;;  %v850_v52 = vmul.f32 %v2391_v38, %v1114_v49  ;;  %v950_v44 = vmul.f32 %v2401_v46, %v1516_v21  ;;  %v2903_v59 = vld [vmem:[#allocation2 + $0xf9] sm:$0xff] }
 0x14a   : > { %v1284_v27 = vadd.f32 %v1252_v54, %v1183_v23  ;;  %v1648_v56 = vpack.c.bf16 %v1623_v22, %v1622_v11  ;;  %v951_v29 = vmul.f32 %v2401_v46, %v1517_v42  ;;  %v1051_v20 = vmul.f32 %v2424_v5, %v2857_v53  ;;  %v1521_v22 = vld [vmem:[#allocation2 + $0xfa] sm:$0xff] }
 0x14b   : > { %v881_v25 = vadd.f32 %v849_v16, %v748_v60  ;;  %v1385_v24 = vadd.f32 %v1353_v19, %v1283_v18  ;;  %v882_v33 = vadd.f32 %v850_v52, %v749_v51  ;;  %v1052_v39 = vmul.f32 %v2424_v5, %v2859_v6  ;;  %v2918_v60 = vld [vmem:[%s3262_s2] ss:$0 sm:$0xff] }
 0x14c   : > { %v1386_v34 = vadd.f32 %v1354_v58, %v1284_v27  ;;  %2187 = vmatprep.mubr.bf16.mxu1 %v1648_v56  ;;  %v1555_v38 = vmul.f32 %v2478_v35, %v1518_v36  ;;  %v1556_v21 = vmul.f32 %v2478_v35, %v1519_v17  ;;  %v1152_v42 = vmul.f32 %v2411_v61, %v2861_v47 }
 0x14d   : > { %v982_v49 = vadd.f32 %v950_v44, %v881_v25  ;;  %v1486_v15 = vadd.f32 %v1454_v30, %v1385_v24  ;;  %v983_v63 = vadd.f32 %v951_v29, %v882_v33  ;;  %v1153_v0 = vmul.f32 %v2411_v61, %v2634_v4 }
 0x14e   : > { %v1487_v10 = vadd.f32 %v1455_v9, %v1386_v34  ;;  %v1253_v31 = vmul.f32 %v2520_v2, %v1518_v36  ;;  %v1254_v41 = vmul.f32 %v2520_v2, %v1519_v17  ;;  %v1355_v54 = vmul.f32 %v2430_v7, %v2891_v50  ;;  %v1520_v9 = vld [vmem:[#allocation2 + $0xf2] sm:$0xff] }
 0x14f   : > { %v1083_v26 = vadd.f32 %v1051_v20, %v982_v49  ;;  %v1587_v13 = vadd.f32 %v1555_v38, %v1486_v15  ;;  %v1084_v58 = vadd.f32 %v1052_v39, %v983_v63  ;;  %v1356_v30 = vmul.f32 %v2430_v7, %v2897_v32  ;;  %v2941_v38 = vld [vmem:[%s3262_s2 + $0x2] ss:$0 sm:$0xff] }
 0x150   : > { %v1588_v19 = vadd.f32 %v1556_v21, %v1487_v10  ;;  %v1456_v43 = vmul.f32 %v2416_v62, %v2901_v40  ;;  %v1457_v23 = vmul.f32 %v2416_v62, %v2903_v59  ;;  %v750_v51 = vmul.f32 %v2918_v60, %v2857_v53  ;;  %v2929_v62 = vld [vmem:[%s3262_s2 + $0x1] ss:$0 sm:$0xff]  ;;  %v2944_v21 = vld [vmem:[#allocation2 + $0x108] sm:$0xff] }
 0x151   : > { %v1184_v11 = vadd.f32 %v1152_v42, %v1083_v26  ;;  %v1624_v16 = vadd.f32 %v2568_v8, %v1587_v13  ;;  %v1185_v27 = vadd.f32 %v1153_v0, %v1084_v58  ;;  %v751_v52 = vmul.f32 %v2918_v60, %v2859_v6  ;;  %v2952_v42 = vld [vmem:[#allocation2 + $0x110] sm:$0xff] }
 0x152   : > { %v1625_v18 = vadd.f32 %v2568_v8, %v1588_v19  ;;  %v851_v56 = vmul.f32 %v2929_v62, %v2861_v47  ;;  %v852_v53 = vmul.f32 %v2929_v62, %v2634_v4  ;;  %v952_v25 = vmul.f32 %v2401_v46, %v1518_v36 }
 0x153   : > { %v1285_v44 = vadd.f32 %v1253_v31, %v1184_v11  ;;  %v1286_v20 = vadd.f32 %v1254_v41, %v1185_v27  ;;  %v1557_v24 = vmul.f32 %v2478_v35, %v1520_v9  ;;  %v1558_v6 = vmul.f32 %v2478_v35, %v1521_v22  ;;  %v1522_v27 = vld [vmem:[#allocation2 + $0x10a] sm:$0xff] }
 0x154   : > { %v1649_v29 = vpack.c.bf16 %v1625_v18, %v1624_v16  ;;  %v883_v33 = vadd.f32 %v851_v56, %v750_v51  ;;  %v884_v39 = vadd.f32 %v852_v53, %v751_v52  ;;  %v953_v47 = vmul.f32 %v2941_v38, %v1519_v17  ;;  %v1523_v52 = vld [vmem:[#allocation2 + $0x112] sm:$0xff] }
 0x155   : > { %v1387_v34 = vadd.f32 %v1355_v54, %v1285_v44  ;;  %v1388_v46 = vadd.f32 %v1356_v30, %v1286_v20  ;;  %v1053_v4 = vmul.f32 %v2424_v5, %v2891_v50  ;;  %v1054_v36 = vmul.f32 %v2424_v5, %v2897_v32  ;;  %v2965_v30 = vld [vmem:[%s3262_s2 + $0x7] ss:$0 sm:$0xff] }
 0x156   : > { %2188 = vmatmul.mubr.bf16.gmra.mxu1 %v1649_v29  ;;  %v1154_v49 = vmul.f32 %v2411_v61, %v2901_v40  ;;  %v984_v10 = vadd.f32 %v952_v25, %v883_v33  ;;  %v985_v63 = vadd.f32 %v953_v47, %v884_v39  ;;  %v1155_v17 = vmul.f32 %v2411_v61, %v2903_v59  ;;  %v2994_v39 = vld [vmem:[#allocation2 + $0x120] sm:$0xff]  ;;  %v2996_v47 = vld [vmem:[#allocation2 + $0x128] sm:$0xff] }
 0x157   : > { %v1488_v15 = vadd.f32 %v1456_v43, %v1387_v34  ;;  %v1489_v0 = vadd.f32 %v1457_v23, %v1388_v46  ;;  %v1255_v26 = vmul.f32 %v2520_v2, %v1520_v9  ;;  %v1256_v31 = vmul.f32 %v2520_v2, %v1521_v22 }
 0x158   : > { %v1357_v41 = vmul.f32 %v2430_v7, %v2944_v21  ;;  %v1085_v54 = vadd.f32 %v1053_v4, %v984_v10  ;;  %v1086_v13 = vadd.f32 %v1054_v36, %v985_v63  ;;  %v1358_v19 = vmul.f32 %v2430_v7, %v2952_v42  ;;  %v3001_v36 = vld [vmem:[%s3262_s2 + $0x4] ss:$0 sm:$0xff] }
 0x159   : > { %v1589_v5 = vadd.f32 %v1557_v24, %v1488_v15  ;;  %v1590_v58 = vadd.f32 %v1558_v6, %v1489_v0  ;;  %v1458_v61 = vmul.f32 %v2965_v30, %v2653_v48  ;;  %v1459_v11 = vmul.f32 %v2965_v30, %v2674_v14  ;;  %v3007_v10 = vld [vmem:[#allocation2 + $0x121] sm:$0xff] }
 0x15a   : > { %v752_v43 = vmul.f32 %v2918_v60, %v2891_v50  ;;  %v1186_v51 = vadd.f32 %v1154_v49, %v1085_v54  ;;  %v1187_v16 = vadd.f32 %v1155_v17, %v1086_v13  ;;  %v753_v7 = vmul.f32 %v2918_v60, %v2897_v32  ;;  %v2986_v32 = vld [vmem:[%s3262_s2 + $0x3] ss:$0 sm:$0xff]  ;;  %v818_v13 = vld [vmem:[#allocation2 + $0x109] sm:$0xff] }
 0x15b   : > { %v1626_v23 = vadd.f32 %v2568_v8, %v1589_v5  ;;  %v1627_v18 = vadd.f32 %v2568_v8, %v1590_v58  ;;  %v853_v44 = vmul.f32 %v2929_v62, %v2901_v40  ;;  %v854_v56 = vmul.f32 %v2929_v62, %v2903_v59  ;;  %v3016_v5 = vld [vmem:[%s3262_s2 + $0x6] ss:$0 sm:$0xff] }
 0x15c   : > { %v954_v53 = vmul.f32 %v2941_v38, %v1520_v9  ;;  %v1287_v50 = vadd.f32 %v1255_v26, %v1186_v51  ;;  %v1288_v25 = vadd.f32 %v1256_v31, %v1187_v16  ;;  %v955_v29 = vmul.f32 %v2941_v38, %v1521_v22 }
 0x15d   : > { %v1055_v20 = vmul.f32 %v2986_v32, %v2944_v21  ;;  %v1650_v24 = vpack.c.bf16 %v1627_v18, %v1626_v23  ;;  %v885_v6 = vadd.f32 %v853_v44, %v752_v43  ;;  %v886_v40 = vadd.f32 %v854_v56, %v753_v7  ;;  %v1525_v44 = vld [vmem:[#allocation2 + $0x12a] sm:$0xff] }
 0x15e   : > { %v1056_v59 = vmul.f32 %v2986_v32, %v2952_v42  ;;  %v1389_v34 = vadd.f32 %v1357_v41, %v1287_v50  ;;  %v1390_v9 = vadd.f32 %v1358_v19, %v1288_v25  ;;  %v1559_v33 = vmul.f32 %v2478_v35, %v1522_v27 }
 0x15f   : > { %v1560_v22 = vmul.f32 %v2478_v35, %v1523_v52  ;;  %2191 = vmatprep.mubr.bf16.mxu1 %v1650_v24  ;;  %v986_v46 = vadd.f32 %v954_v53, %v885_v6  ;;  %v987_v4 = vadd.f32 %v955_v29, %v886_v40  ;;  %v1156_v49 = vmul.f32 %v3001_v36, %v2653_v48  ;;  %v3009_v35 = vld [vmem:[#allocation2 + $0x129] sm:$0xff]  ;;  %v3038_v29 = vld [vmem:[%s3262_s2 + $0x8] ss:$0 sm:$0xff] }
 0x160   : > { %v1157_v15 = vmul.f32 %v3001_v36, %v2674_v14  ;;  %v1490_v63 = vadd.f32 %v1458_v61, %v1389_v34  ;;  %v1491_v17 = vadd.f32 %v1459_v11, %v1390_v9  ;;  %v1257_v0 = vmul.f32 %v2520_v2, %v1522_v27  ;;  %v1524_v11 = vld [vmem:[#allocation2 + $0x122] sm:$0xff] }
 0x161   : > { %v1258_v26 = vmul.f32 %v2520_v2, %v1523_v52  ;;  %v1087_v31 = vadd.f32 %v1055_v20, %v986_v46  ;;  %v1088_v41 = vadd.f32 %v1056_v59, %v987_v4  ;;  %v1359_v48 = vmul.f32 %v3016_v5, %v2994_v39 }
 0x162   : > { %v1360_v54 = vmul.f32 %v3016_v5, %v2996_v47  ;;  %v1591_v19 = vadd.f32 %v1559_v33, %v1490_v63  ;;  %v1592_v58 = vadd.f32 %v1560_v22, %v1491_v17  ;;  %v1460_v61 = vmul.f32 %v2965_v30, %v3007_v10  ;;  %v3046_v33 = vld [vmem:[#allocation2 + $0x138] sm:$0xff]  ;;  %v3059_v17 = vld [vmem:[%s3262_s2 + $0x5] ss:$0 sm:$0xff] }
 0x163   : > { %v1461_v2 = vmul.f32 %v2965_v30, %v3009_v35  ;;  %v1188_v43 = vadd.f32 %v1156_v49, %v1087_v31  ;;  %v1189_v23 = vadd.f32 %v1157_v15, %v1088_v41  ;;  %v754_v51 = vmul.f32 %v2918_v60, %v2944_v21  ;;  %v3052_v49 = vld [vmem:[#allocation2 + $0x140] sm:$0xff] }
 0x164   : > { %v755_v16 = vmul.f32 %v2918_v60, %v2952_v42  ;;  %v1628_v7 = vadd.f32 %v2568_v8, %v1591_v19  ;;  %v1629_v18 = vadd.f32 %v2568_v8, %v1592_v58  ;;  %v855_v56 = vmul.f32 %v2929_v62, %v818_v13 }
 0x165   : > { %v856_v53 = vmul.f32 %v2929_v62, %v2674_v14  ;;  %v1289_v50 = vadd.f32 %v1257_v0, %v1188_v43  ;;  %v1290_v25 = vadd.f32 %v1258_v26, %v1189_v23  ;;  %v1561_v21 = vmul.f32 %v3038_v29, %v1524_v11 }
 0x166   : > { %v956_v42 = vmul.f32 %v2941_v38, %v1522_v27  ;;  %v1651_v20 = vpack.c.bf16 %v1629_v18, %v1628_v7  ;;  %v887_v24 = vadd.f32 %v855_v56, %v754_v51  ;;  %v957_v40 = vmul.f32 %v2941_v38, %v1523_v52 }
 0x167   : > { %v888_v6 = vadd.f32 %v856_v53, %v755_v16  ;;  %v1391_v59 = vadd.f32 %v1359_v48, %v1289_v50  ;;  %v1392_v34 = vadd.f32 %v1360_v54, %v1290_v25  ;;  %v1562_v14 = vmul.f32 %v3038_v29, %v1525_v44  ;;  %v1526_v50 = vld [vmem:[#allocation2 + $0x13a] sm:$0xff] }
 0x168   : > { %v1057_v9 = vmul.f32 %v2986_v32, %v2994_v39  ;;  %2192 = vmatmul.mubr.bf16.gmra.mxu1 %v1651_v20  ;;  %v988_v22 = vadd.f32 %v956_v42, %v887_v24  ;;  %v1058_v27 = vmul.f32 %v2986_v32, %v2996_v47  ;;  %v1158_v4 = vmul.f32 %v3001_v36, %v3007_v10 }
 0x169   : > { %v989_v46 = vadd.f32 %v957_v40, %v888_v6  ;;  %v1492_v52 = vadd.f32 %v1460_v61, %v1391_v59  ;;  %v1493_v15 = vadd.f32 %v1461_v2, %v1392_v34  ;;  %v1159_v63 = vmul.f32 %v3001_v36, %v3009_v35 }
 0x16a   : > { %v1259_v0 = vmul.f32 %v3059_v17, %v1524_v11  ;;  %v1089_v26 = vadd.f32 %v1057_v9, %v988_v22  ;;  %v1260_v41 = vmul.f32 %v3059_v17, %v1525_v44  ;;  %v1361_v48 = vmul.f32 %v3016_v5, %v3046_v33  ;;  %v1326_v22 = vld [vmem:[#allocation2 + $0x150] sm:$0xff] }
 0x16b   : > { %v1090_v31 = vadd.f32 %v1058_v27, %v989_v46  ;;  %v1593_v54 = vadd.f32 %v1561_v21, %v1492_v52  ;;  %v1594_v13 = vadd.f32 %v1562_v14, %v1493_v15  ;;  %v1362_v19 = vmul.f32 %v3016_v5, %v3052_v49 }
 0x16c   : > { %v1462_v58 = vmul.f32 %v2965_v30, %v2705_v12  ;;  %v1190_v61 = vadd.f32 %v1158_v4, %v1089_v26  ;;  %v1463_v43 = vmul.f32 %v2965_v30, %v2752_v1  ;;  %v756_v23 = vmul.f32 %v2918_v60, %v2994_v39  ;;  %v1527_v39 = vld [vmem:[#allocation2 + $0x142] sm:$0xff] }
 0x16d   : > { %v1191_v2 = vadd.f32 %v1159_v63, %v1090_v31  ;;  %v1630_v51 = vadd.f32 %v2568_v8, %v1593_v54  ;;  %v1631_v16 = vadd.f32 %v2568_v8, %v1594_v13  ;;  %v757_v7 = vmul.f32 %v2918_v60, %v2996_v47  ;;  %v822_v31 = vld [vmem:[#allocation2 + $0x139] sm:$0xff]  ;;  %v1427_v13 = vld [vmem:[#allocation2 + $0x151] sm:$0xff] }
 0x16e   : > { %v857_v18 = vmul.f32 %v2929_v62, %v3007_v10  ;;  %v1291_v56 = vadd.f32 %v1259_v0, %v1190_v61  ;;  %v858_v25 = vmul.f32 %v2929_v62, %v3009_v35  ;;  %v958_v21 = vmul.f32 %v2941_v38, %v1524_v11 }
 0x16f   : > { %v1292_v53 = vadd.f32 %v1260_v41, %v1191_v2  ;;  %v1652_v42 = vpack.c.bf16 %v1631_v16, %v1630_v51  ;;  %v959_v24 = vmul.f32 %v2941_v38, %v1525_v44  ;;  %v1059_v8 = vmul.f32 %v2986_v32, %v3046_v33  ;;  %v1327_v44 = vld [vmem:[#allocation2 + $0x158] sm:$0xff] }
 0x170   : > { %v889_v20 = vadd.f32 %v857_v18, %v756_v23  ;;  %v1393_v47 = vadd.f32 %v1361_v48, %v1291_v56  ;;  %v890_v40 = vadd.f32 %v858_v25, %v757_v7  ;;  %v1060_v10 = vmul.f32 %v2986_v32, %v3052_v49  ;;  %v1528_v51 = vld [vmem:[#allocation2 + $0x152] sm:$0xff]  ;;  %v1529_v16 = vld [vmem:[#allocation2 + $0x15a] sm:$0xff] }
 0x171   : > { %v1394_v6 = vadd.f32 %v1362_v19, %v1292_v53  ;;  %2195 = vmatprep.mubr.bf16.mxu1 %v1652_v42  ;;  %v1563_v59 = vmul.f32 %v3038_v29, %v1526_v50  ;;  %v1564_v14 = vmul.f32 %v3038_v29, %v1527_v39  ;;  %v1160_v27 = vmul.f32 %v3001_v36, %v2705_v12  ;;  %v3102_v19 = vld [vmem:[%s3264_s4 + $0x1] ss:$0 sm:$0xff] }
 0x172   : > { %v990_v35 = vadd.f32 %v958_v21, %v889_v20  ;;  %v1494_v34 = vadd.f32 %v1462_v58, %v1393_v47  ;;  %v991_v9 = vadd.f32 %v959_v24, %v890_v40  ;;  %v1161_v4 = vmul.f32 %v3001_v36, %v2752_v1 }
 0x173   : > { %v1495_v11 = vadd.f32 %v1463_v43, %v1394_v6  ;;  %v1261_v52 = vmul.f32 %v3059_v17, %v1526_v50  ;;  %v1262_v26 = vmul.f32 %v3059_v17, %v1527_v39  ;;  %v1363_v48 = vmul.f32 %v3016_v5, %v1326_v22 }
 0x174   : > { %v1091_v46 = vadd.f32 %v1059_v8, %v990_v35  ;;  %v1595_v15 = vadd.f32 %v1563_v59, %v1494_v34  ;;  %v1092_v0 = vadd.f32 %v1060_v10, %v991_v9  ;;  %v1364_v54 = vmul.f32 %v3016_v5, %v1327_v44  ;;  %v1126_v8 = vld [vmem:[#allocation2 + $0x159] sm:$0xff]  ;;  %v1329_v35 = vld [vmem:[#allocation2 + $0x170] sm:$0xff] }
 0x175   : > { %v1596_v63 = vadd.f32 %v1564_v14, %v1495_v11  ;;  %v758_v12 = vmul.f32 %v2918_v60, %v3046_v33  ;;  %v759_v43 = vmul.f32 %v2918_v60, %v3052_v49  ;;  %v859_v7 = vmul.f32 %v2929_v62, %v822_v31 }
 0x176   : > { %v1192_v41 = vadd.f32 %v1160_v27, %v1091_v46  ;;  %v1632_v58 = vadd.f32 %v3102_v19, %v1595_v15  ;;  %v1193_v2 = vadd.f32 %v1161_v4, %v1092_v0  ;;  %v860_v33 = vmul.f32 %v2929_v62, %v2752_v1 }
 0x177   : > { %v1633_v61 = vadd.f32 %v3102_v19, %v1596_v63  ;;  %v960_v18 = vmul.f32 %v2941_v38, %v1526_v50  ;;  %v1464_v25 = vmul.f32 %v2965_v30, %v1427_v13  ;;  %v1465_v21 = vmul.f32 %v2965_v30, %v614_v45  ;;  %v1328_v45 = vld [vmem:[#allocation2 + $0x168] sm:$0xff] }
 0x178   : > { %v1293_v23 = vadd.f32 %v1261_v52, %v1192_v41  ;;  %v1294_v53 = vadd.f32 %v1262_v26, %v1193_v2  ;;  %v891_v49 = vadd.f32 %v859_v7, %v758_v12  ;;  %v892_v20 = vadd.f32 %v860_v33, %v759_v43 }
 0x179   : > { %v1653_v56 = vpack.c.bf16 %v1633_v61, %v1632_v58  ;;  %v961_v24 = vmul.f32 %v2941_v38, %v1527_v39  ;;  %v1565_v1 = vmul.f32 %v3038_v29, %v1528_v51  ;;  %v1566_v50 = vmul.f32 %v3038_v29, %v1529_v16 }
 0x17a   : > { %v1395_v42 = vadd.f32 %v1363_v48, %v1293_v23  ;;  %v1396_v47 = vadd.f32 %v1364_v54, %v1294_v53  ;;  %v1061_v6 = vmul.f32 %v2986_v32, %v1326_v22  ;;  %v992_v10 = vadd.f32 %v960_v18, %v891_v49  ;;  %v1530_v23 = vld [vmem:[#allocation2 + $0x16a] sm:$0xff]  ;;  %v1531_v18 = vld [vmem:[#allocation2 + $0x172] sm:$0xff] }
 0x17b   : > { %2196 = vmatmul.mubr.bf16.gmra.mxu1 %v1653_v56  ;;  %v993_v59 = vadd.f32 %v961_v24, %v892_v20  ;;  %v1062_v28 = vmul.f32 %v2986_v32, %v1327_v44  ;;  %v1162_v11 = vmul.f32 %v3001_v36, %v1427_v13  ;;  %v1163_v39 = vmul.f32 %v3001_v36, %v1126_v8  ;;  %v1330_v20 = vld [vmem:[#allocation2 + $0x180] sm:$0xff] }
 0x17c   : > { %v1496_v40 = vadd.f32 %v1464_v25, %v1395_v42  ;;  %v1497_v34 = vadd.f32 %v1465_v21, %v1396_v47  ;;  %v1263_v14 = vmul.f32 %v3059_v17, %v1528_v51  ;;  %v1093_v46 = vadd.f32 %v1061_v6, %v992_v10 }
 0x17d   : > { %v1094_v27 = vadd.f32 %v1062_v28, %v993_v59  ;;  %v1264_v4 = vmul.f32 %v3059_v17, %v1529_v16  ;;  %v1365_v15 = vmul.f32 %v3016_v5, %v1328_v45  ;;  %v1366_v63 = vmul.f32 %v3016_v5, %v1329_v35  ;;  %v826_v59 = vld [vmem:[#allocation2 + $0x169] sm:$0xff] }
 0x17e   : > { %v1597_v9 = vadd.f32 %v1565_v1, %v1496_v40  ;;  %v1598_v52 = vadd.f32 %v1566_v50, %v1497_v34  ;;  %v760_v0 = vmul.f32 %v2918_v60, %v1326_v22  ;;  %v1194_v31 = vadd.f32 %v1162_v11, %v1093_v46 }
 0x17f   : > { %v1195_v41 = vadd.f32 %v1163_v39, %v1094_v27  ;;  %v761_v48 = vmul.f32 %v2918_v60, %v1327_v44  ;;  %v861_v12 = vmul.f32 %v2929_v62, %v1427_v13  ;;  %v862_v58 = vmul.f32 %v2929_v62, %v1126_v8  ;;  %v1331_v39 = vld [vmem:[#allocation2 + $0x188] sm:$0xff] }
 0x180   : > { %v1634_v26 = vadd.f32 %v3102_v19, %v1597_v9  ;;  %v1635_v54 = vadd.f32 %v3102_v19, %v1598_v52  ;;  %v962_v61 = vmul.f32 %v2941_v38, %v1528_v51  ;;  %v1295_v2 = vadd.f32 %v1263_v14, %v1194_v31 }
 0x181   : > { %v1296_v43 = vadd.f32 %v1264_v4, %v1195_v41  ;;  %v963_v7 = vmul.f32 %v2941_v38, %v1529_v16  ;;  %v1063_v22 = vmul.f32 %v2986_v32, %v1328_v45  ;;  %v893_v56 = vadd.f32 %v861_v12, %v760_v0  ;;  %v1533_v12 = vld [vmem:[#allocation2 + $0x18a] sm:$0xff] }
 0x182   : > { %v1654_v33 = vpack.c.bf16 %v1635_v54, %v1634_v26  ;;  %v894_v53 = vadd.f32 %v862_v58, %v761_v48  ;;  %v1064_v44 = vmul.f32 %v2986_v32, %v1329_v35  ;;  %v1397_v25 = vadd.f32 %v1365_v15, %v1295_v2  ;;  %v1431_v15 = vld [vmem:[#allocation2 + $0x181] sm:$0xff] }
 0x183   : > { %v1398_v21 = vadd.f32 %v1366_v63, %v1296_v43  ;;  %v1466_v13 = vmul.f32 %v2965_v30, %v2799_v55  ;;  %v1467_v51 = vmul.f32 %v2965_v30, %v2846_v37  ;;  %v1567_v42 = vmul.f32 %v3038_v29, %v1530_v23 }
 0x184   : > { %2199 = vmatprep.mubr.bf16.mxu1 %v1654_v33  ;;  %v994_v16 = vadd.f32 %v962_v61, %v893_v56  ;;  %v995_v49 = vadd.f32 %v963_v7, %v894_v53  ;;  %v1568_v47 = vmul.f32 %v3038_v29, %v1531_v18  ;;  %v1164_v1 = vmul.f32 %v3001_v36, %v2799_v55 }
 0x185   : > { %v1498_v24 = vadd.f32 %v1466_v13, %v1397_v25  ;;  %v1499_v8 = vadd.f32 %v1467_v51, %v1398_v21  ;;  %v1165_v40 = vmul.f32 %v3001_v36, %v2846_v37  ;;  %v1265_v10 = vmul.f32 %v3059_v17, %v1530_v23 }
 0x186   : > { %v1095_v50 = vadd.f32 %v1063_v22, %v994_v16  ;;  %v1096_v6 = vadd.f32 %v1064_v44, %v995_v49  ;;  %v1266_v11 = vmul.f32 %v3059_v17, %v1531_v18  ;;  %v1367_v14 = vmul.f32 %v3016_v5, %v1330_v20  ;;  %v1332_v44 = vld [vmem:[#allocation2 + $0x198] sm:$0xff]  ;;  %v1434_v49 = vld [vmem:[#allocation2 + $0x1a1] sm:$0xff] }
 0x187   : > { %v1599_v28 = vadd.f32 %v1567_v42, %v1498_v24  ;;  %v1600_v34 = vadd.f32 %v1568_v47, %v1499_v8  ;;  %v762_v27 = vmul.f32 %v2918_v60, %v1328_v45  ;;  %v763_v55 = vmul.f32 %v2918_v60, %v1329_v35  ;;  %v1532_v45 = vld [vmem:[#allocation2 + $0x182] sm:$0xff] }
 0x188   : > { %v1196_v9 = vadd.f32 %v1164_v1, %v1095_v50  ;;  %v1197_v46 = vadd.f32 %v1165_v40, %v1096_v6  ;;  %v863_v63 = vmul.f32 %v2929_v62, %v826_v59  ;;  %v864_v0 = vmul.f32 %v2929_v62, %v2846_v37  ;;  %v1130_v62 = vld [vmem:[#allocation2 + $0x189] sm:$0xff] }
 0x189   : > { %v1636_v4 = vadd.f32 %v3102_v19, %v1599_v28  ;;  %v1637_v52 = vadd.f32 %v3102_v19, %v1600_v34  ;;  %v1368_v41 = vmul.f32 %v3016_v5, %v1331_v39  ;;  %v964_v48 = vmul.f32 %v2941_v38, %v1530_v23  ;;  %v2258_v47 = vld [vmem:[#allocation2 + $0x8] sm:$0xff] }
 0x18a   : > { %v1297_v26 = vadd.f32 %v1265_v10, %v1196_v9  ;;  %v1298_v31 = vadd.f32 %v1266_v11, %v1197_v46  ;;  %v895_v60 = vadd.f32 %v863_v63, %v762_v27  ;;  %v896_v35 = vadd.f32 %v864_v0, %v763_v55  ;;  %v1535_v40 = vld [vmem:[#allocation2 + $0x1a2] sm:$0xff] }
 0x18b   : > { %v1655_v54 = vpack.c.bf16 %v1637_v52, %v1636_v4  ;;  %v965_v58 = vmul.f32 %v2941_v38, %v1531_v18  ;;  %v1468_v43 = vmul.f32 %v2965_v30, %v1431_v15  ;;  %v1469_v37 = vmul.f32 %v2965_v30, %v618_v3 }
 0x18c   : > { %v1399_v61 = vadd.f32 %v1367_v14, %v1297_v26  ;;  %v1400_v2 = vadd.f32 %v1368_v41, %v1298_v31  ;;  %v996_v7 = vadd.f32 %v964_v48, %v895_v60  ;;  %v1065_v23 = vmul.f32 %v2986_v32, %v1330_v20 }
 0x18d   : > { %2200 = vmatmul.mubr.bf16.gmra.mxu1 %v1655_v54  ;;  %v997_v22 = vadd.f32 %v965_v58, %v896_v35  ;;  %v1066_v33 = vmul.f32 %v2986_v32, %v1331_v39  ;;  %v1569_v38 = vmul.f32 %v3038_v29, %v1532_v45  ;;  %v1570_v18 = vmul.f32 %v3038_v29, %v1533_v12  ;;  %v1433_v32 = vld [vmem:[#allocation2 + $0x199] sm:$0xff] }
 0x18e   : > { %v1500_v56 = vadd.f32 %v1468_v43, %v1399_v61  ;;  %v1501_v53 = vadd.f32 %v1469_v37, %v1400_v2  ;;  %v1097_v25 = vadd.f32 %v1065_v23, %v996_v7  ;;  %v1166_v57 = vmul.f32 %v3001_v36, %v1431_v15 }
 0x18f   : > { %v1098_v21 = vadd.f32 %v1066_v33, %v997_v22  ;;  %v1167_v3 = vmul.f32 %v3001_v36, %v1130_v62  ;;  %v1267_v42 = vmul.f32 %v3059_v17, %v1532_v45  ;;  %v1268_v16 = vmul.f32 %v3059_v17, %v1533_v12  ;;  %v1534_v36 = vld [vmem:[#allocation2 + $0x19a] sm:$0xff] }
 0x190   : > { %v1601_v13 = vadd.f32 %v1569_v38, %v1500_v56  ;;  %v1602_v51 = vadd.f32 %v1570_v18, %v1501_v53  ;;  %v1198_v20 = vadd.f32 %v1166_v57, %v1097_v25  ;;  %v1369_v8 = vmul.f32 %v3016_v5, %v1332_v44 }
 0x191   : > { %v1199_v24 = vadd.f32 %v1167_v3, %v1098_v21  ;;  %v1370_v1 = vmul.f32 %v2258_v47, %v3016_v5  ;;  %v1470_v28 = vmul.f32 %v2965_v30, %v1433_v32  ;;  %v1471_v17 = vmul.f32 %v2965_v30, %v1434_v49  ;;  %v3185_v30 = vld [vmem:[%s3264_s4 + $0x2] ss:$0 sm:$0xff] }
 0x192   : > { %v1638_v50 = vadd.f32 %v3102_v19, %v1601_v13  ;;  %v1639_v6 = vadd.f32 %v3102_v19, %v1602_v51  ;;  %v1299_v10 = vadd.f32 %v1267_v42, %v1198_v20  ;;  %v1571_v14 = vmul.f32 %v3038_v29, %v1534_v36 }
 0x193   : > { %v1300_v59 = vadd.f32 %v1268_v16, %v1199_v24  ;;  %v1572_v5 = vmul.f32 %v3038_v29, %v1535_v40 }
 0x194   : > { %v1656_v34 = vpack.c.bf16 %v1639_v6, %v1638_v50  ;;  %v1401_v11 = vadd.f32 %v1369_v8, %v1299_v10 }
 0x195   : > { %v1402_v39 = vadd.f32 %v1370_v1, %v1300_v59 }
 0x196   : > { %2203 = vmatprep.mubr.bf16.mxu1 %v1656_v34  ;;  %v1502_v9 = vadd.f32 %v1470_v28, %v1401_v11 }
 0x197   : > { %v1503_v46 = vadd.f32 %v1471_v17, %v1402_v39 }
 0x198   : > { %v1603_v27 = vadd.f32 %v1571_v14, %v1502_v9 }
 0x199   : > { %v1604_v55 = vadd.f32 %v1572_v5, %v1503_v46 }
 0x19a   : > { %v1640_v4 = vadd.f32 %v3102_v19, %v1603_v27 }
 0x19b   : > { %v1641_v52 = vadd.f32 %v3102_v19, %v1604_v55 }
 0x19d   : > { %v1657_v15 = vpack.c.bf16 %v1641_v52, %v1640_v4 }
 0x19f   : > { %2204 = vmatmul.mubr.bf16.gmra.mxu1 %v1657_v15 }
 0x1d6   : > { %v2177_v63 = vpop.f32.mrf.mxu1 }
 0x1d7   : > { %v1770_v29 = vadd.f32 %v2177_v63, %v3185_v30 }
 0x1d8   : > { %v1761_v19 = vpop.f32.mrf.mxu1 }
 0x1d9   : > { %v1890_v0 = vmax.f32 %v1770_v29, 0.0  ;;  %v1762_v26 = vadd.f32 %v3185_v30, %v1761_v19 }
 0x1da   : > { %v2178_v31 = vpop.f32.mrf.mxu1 }
 0x1db   : > { %1922 = vst [vmem:[%s3192_s10 + $0x10] sm:$0xff] %v1890_v0  ;;  %v1888_v41 = vmax.f32 %v1762_v26, 0.0  ;;  %v1773_v48 = vadd.f32 %v2178_v31, %v3185_v30 }
 0x1dc   : > { %v1764_v54 = vpop.f32.mrf.mxu1 }
 0x1dd   : > { %1920 = vst [vmem:[%s3192_s10] sm:$0xff] %v1888_v41  ;;  %v1891_v45 = vmax.f32 %v1773_v48, 0.0  ;;  %v1765_v12 = vadd.f32 %v3185_v30, %v1764_v54 }
 0x1df   : > { %1923 = vst [vmem:[%s3192_s10 + $0x18] sm:$0xff] %v1891_v45  ;;  %v1889_v60 = vmax.f32 %v1765_v12, 0.0 }
 0x1e1   : > { %1921 = vst [vmem:[%s3192_s10 + $0x8] sm:$0xff] %v1889_v60 }
 0x1ec   : > { %v2181_v35 = vpop.f32.mrf.mxu1 }
 0x1ed   : > { %v1786_v58 = vadd.f32 %v2181_v35, %v3185_v30 }
 0x1ee   : > { %v1777_v61 = vpop.f32.mrf.mxu1 }
 0x1ef   : > { %v1894_v2 = vmax.f32 %v1786_v58, 0.0  ;;  %v1778_v43 = vadd.f32 %v3185_v30, %v1777_v61 }
 0x1f0   : > { %v2182_v37 = vpop.f32.mrf.mxu1 }
 0x1f1   : > { %1926 = vst [vmem:[%s3192_s10 + $0x30] sm:$0xff] %v1894_v2  ;;  %v1892_v62 = vmax.f32 %v1778_v43, 0.0  ;;  %v1789_v7 = vadd.f32 %v2182_v37, %v3185_v30 }
 0x1f2   : > { %v1780_v22 = vpop.f32.mrf.mxu1 }
 0x1f3   : > { %1924 = vst [vmem:[%s3192_s10 + $0x20] sm:$0xff] %v1892_v62  ;;  %v1895_v23 = vmax.f32 %v1789_v7, 0.0  ;;  %v1781_v33 = vadd.f32 %v3185_v30, %v1780_v22 }
 0x1f5   : > { %1927 = vst [vmem:[%s3192_s10 + $0x38] sm:$0xff] %v1895_v23  ;;  %v1893_v56 = vmax.f32 %v1781_v33, 0.0 }
 0x1f7   : > { %1925 = vst [vmem:[%s3192_s10 + $0x28] sm:$0xff] %v1893_v56 }
 0x202   : > { %v2185_v53 = vpop.f32.mrf.mxu1 }
 0x203   : > { %v1802_v38 = vadd.f32 %v2185_v53, %v3185_v30 }
 0x204   : > { %v1793_v18 = vpop.f32.mrf.mxu1 }
 0x205   : > { %v1898_v44 = vmax.f32 %v1802_v38, 0.0  ;;  %v1794_v25 = vadd.f32 %v3185_v30, %v1793_v18 }
 0x206   : > { %v2186_v21 = vpop.f32.mrf.mxu1 }
 0x207   : > { %1930 = vst [vmem:[%s3192_s10 + $0x50] sm:$0xff] %v1898_v44  ;;  %v1896_v57 = vmax.f32 %v1794_v25, 0.0  ;;  %v1805_v3 = vadd.f32 %v2186_v21, %v3185_v30 }
 0x208   : > { %v1796_v13 = vpop.f32.mrf.mxu1 }
 0x209   : > { %1928 = vst [vmem:[%s3192_s10 + $0x40] sm:$0xff] %v1896_v57  ;;  %v1899_v51 = vmax.f32 %v1805_v3, 0.0  ;;  %v1797_v42 = vadd.f32 %v3185_v30, %v1796_v13 }
 0x20b   : > { %1931 = vst [vmem:[%s3192_s10 + $0x58] sm:$0xff] %v1899_v51  ;;  %v1897_v16 = vmax.f32 %v1797_v42, 0.0 }
 0x20d   : > { %1929 = vst [vmem:[%s3192_s10 + $0x48] sm:$0xff] %v1897_v16 }
 0x216   : > { %v2189_v32 = vpop.f32.mrf.mxu1 }
 0x217   : > { %v1818_v49 = vadd.f32 %v2189_v32, %v3185_v30 }
 0x218   : > { %v1809_v20 = vpop.f32.mrf.mxu1 }
 0x219   : > { %v1902_v24 = vmax.f32 %v1818_v49, 0.0  ;;  %v1810_v8 = vadd.f32 %v3185_v30, %v1809_v20 }
 0x21a   : > { %v2190_v47 = vpop.f32.mrf.mxu1 }
 0x21b   : > { %1934 = vst [vmem:[%s3192_s10 + $0x70] sm:$0xff] %v1902_v24  ;;  %v1900_v1 = vmax.f32 %v1810_v8, 0.0  ;;  %v1821_v50 = vadd.f32 %v2190_v47, %v3185_v30 }
 0x21c   : > { %v1812_v6 = vpop.f32.mrf.mxu1 }
 0x21d   : > { %1932 = vst [vmem:[%s3192_s10 + $0x60] sm:$0xff] %v1900_v1  ;;  %v1903_v36 = vmax.f32 %v1821_v50, 0.0  ;;  %v1813_v40 = vadd.f32 %v3185_v30, %v1812_v6 }
 0x21f   : > { %1935 = vst [vmem:[%s3192_s10 + $0x78] sm:$0xff] %v1903_v36  ;;  %v1901_v10 = vmax.f32 %v1813_v40, 0.0 }
 0x221   : > { %1933 = vst [vmem:[%s3192_s10 + $0x68] sm:$0xff] %v1901_v10 }
 0x228   : > { %v2193_v59 = vpop.f32.mrf.mxu1 }
 0x229   : > { %v1834_v28 = vadd.f32 %v2193_v59, %v3185_v30 }
 0x22a   : > { %v1825_v17 = vpop.f32.mrf.mxu1 }
 0x22b   : > { %v1906_v34 = vmax.f32 %v1834_v28, 0.0  ;;  %v1826_v11 = vadd.f32 %v3185_v30, %v1825_v17 }
 0x22c   : > { %v2194_v39 = vpop.f32.mrf.mxu1 }
 0x22d   : > { %1938 = vst [vmem:[%s3192_s10 + $0x90] sm:$0xff] %v1906_v34  ;;  %v1904_v14 = vmax.f32 %v1826_v11, 0.0  ;;  %v1837_v5 = vadd.f32 %v2194_v39, %v3185_v30 }
 0x22e   : > { %v1828_v9 = vpop.f32.mrf.mxu1 }
 0x22f   : > { %1936 = vst [vmem:[%s3192_s10 + $0x80] sm:$0xff] %v1904_v14  ;;  %v1907_v46 = vmax.f32 %v1837_v5, 0.0  ;;  %v1829_v27 = vadd.f32 %v3185_v30, %v1828_v9 }
 0x231   : > { %1939 = vst [vmem:[%s3192_s10 + $0x98] sm:$0xff] %v1907_v46  ;;  %v1905_v55 = vmax.f32 %v1829_v27, 0.0 }
 0x233   : > { %1937 = vst [vmem:[%s3192_s10 + $0x88] sm:$0xff] %v1905_v55 }
 0x23b   : > { %v2197_v4 = vpop.f32.mrf.mxu1 }
 0x23c   : > { %v1850_v52 = vadd.f32 %v2197_v4, %v3185_v30 }
 0x23d   : > { %v1841_v15 = vpop.f32.mrf.mxu1 }
 0x23e   : > { %v1910_v63 = vmax.f32 %v1850_v52, 0.0  ;;  %v1842_v29 = vadd.f32 %v3185_v30, %v1841_v15 }
 0x23f   : > { %v2198_v19 = vpop.f32.mrf.mxu1 }
 0x240   : > { %1942 = vst [vmem:[%s3192_s10 + $0xb0] sm:$0xff] %v1910_v63  ;;  %v1908_v0 = vmax.f32 %v1842_v29, 0.0  ;;  %v1853_v26 = vadd.f32 %v2198_v19, %v3185_v30 }
 0x241   : > { %v1844_v31 = vpop.f32.mrf.mxu1 }
 0x242   : > { %1940 = vst [vmem:[%s3192_s10 + $0xa0] sm:$0xff] %v1908_v0  ;;  %v1911_v41 = vmax.f32 %v1853_v26, 0.0  ;;  %v1845_v48 = vadd.f32 %v3185_v30, %v1844_v31 }
 0x244   : > { %1943 = vst [vmem:[%s3192_s10 + $0xb8] sm:$0xff] %v1911_v41  ;;  %v1909_v54 = vmax.f32 %v1845_v48, 0.0 }
 0x246   : > { %1941 = vst [vmem:[%s3192_s10 + $0xa8] sm:$0xff] %v1909_v54 }
 0x24d   : > { %v2201_v45 = vpop.f32.mrf.mxu1 }
 0x24e   : > { %v1866_v12 = vadd.f32 %v2201_v45, %v3185_v30 }
 0x24f   : > { %v1857_v60 = vpop.f32.mrf.mxu1 }
 0x250   : > { %v1914_v35 = vmax.f32 %v1866_v12, 0.0  ;;  %v1858_v58 = vadd.f32 %v3185_v30, %v1857_v60 }
 0x251   : > { %v2202_v61 = vpop.f32.mrf.mxu1 }
 0x252   : > { %1946 = vst [vmem:[%s3192_s10 + $0xd0] sm:$0xff] %v1914_v35  ;;  %v1912_v2 = vmax.f32 %v1858_v58, 0.0  ;;  %v1869_v43 = vadd.f32 %v2202_v61, %v3185_v30 }
 0x253   : > { %v1860_v37 = vpop.f32.mrf.mxu1 }
 0x254   : > { %1944 = vst [vmem:[%s3192_s10 + $0xc0] sm:$0xff] %v1912_v2  ;;  %v1915_v62 = vmax.f32 %v1869_v43, 0.0  ;;  %v1861_v7 = vadd.f32 %v3185_v30, %v1860_v37 }
 0x256   : > { %1947 = vst [vmem:[%s3192_s10 + $0xd8] sm:$0xff] %v1915_v62  ;;  %v1913_v22 = vmax.f32 %v1861_v7, 0.0 }
 0x258   : > { %1945 = vst [vmem:[%s3192_s10 + $0xc8] sm:$0xff] %v1913_v22 }
 0x25f   : > { %v2205_v23 = vpop.f32.mrf.mxu1 }
 0x260   : > { %v1882_v33 = vadd.f32 %v2205_v23, %v3185_v30 }
 0x261   : > { %v1873_v56 = vpop.f32.mrf.mxu1 }
 0x262   : > { %v1918_v53 = vmax.f32 %v1882_v33, 0.0  ;;  %v1874_v38 = vadd.f32 %v3185_v30, %v1873_v56 }
 0x263   : > { %v2206_v18 = vpop.f32.mrf.mxu1 }
 0x264   : > { %1950 = vst [vmem:[%s3192_s10 + $0xf0] sm:$0xff] %v1918_v53  ;;  %v1916_v44 = vmax.f32 %v1874_v38, 0.0  ;;  %v1885_v25 = vadd.f32 %v2206_v18, %v3185_v30 }
 0x265   : > { %v1876_v21 = vpop.f32.mrf.mxu1 }
 0x266   : > { %1948 = vst [vmem:[%s3192_s10 + $0xe0] sm:$0xff] %v1916_v44  ;;  %v1919_v57 = vmax.f32 %v1885_v25, 0.0  ;;  %v1877_v3 = vadd.f32 %v3185_v30, %v1876_v21 }
 0x268   : > { %1951 = vst [vmem:[%s3192_s10 + $0xf8] sm:$0xff] %v1919_v57  ;;  %v1917_v13 = vmax.f32 %v1877_v3, 0.0 }
 0x26a   : > { %1949 = vst [vmem:[%s3192_s10 + $0xe8] sm:$0xff] %v1917_v13 }
 0x26b PF: > { %s15_s18 = sadd.s32 1, %s2265_s18  }
 0x26c   : > { %p12_p4 = scmp.ge.s32.totalorder %s15_s18, 4  }
 0x26e   :  { %14 = sbr.rel (!%p12_p4) target bundleno = 1 (0x1), region = 73 }

</bundles_post_ra>
